<compile_context>
chip_gen: v7x
topology: tpu7x:2x2x1
jax: 0.10.0
libtpu: 0.0.40
codegen_flags: <defaults>
</compile_context>

<pallas_src>
import functools
import math

import jax
import jax.numpy as jnp
from jax.experimental import pallas as pl
from jax.experimental.pallas import tpu as pltpu


def _fused_striped_kernel(x_ref, masks_ref, w1_ref, b1_ref, w2_ref, b2_ref,
                          w3_ref, b3_ref, o_ref, *scratch_refs,
                          C, K, W, D, out_is_f32):
    """Fused W->H->D striped conv for one batch element.

    x_ref / o_ref : (C, Dp, HWp)   input / output volume (NCDHW, HW folded+padded)
    masks_ref     : (rows, HWp) f32 VMEM; row t   = W-conv tap-t boundary mask,
                                          row K+t = H-conv tap-t boundary mask.
    w*_ref        : (C*C*K,) f32 SMEM, flattened torch weight (Cout, Cin, K)
    b*_ref        : (C,)     f32 SMEM bias
    scratch_refs  : one or two (C, Dp, HWp) f32 VMEM intermediates
    """
    Dp, HWp = x_ref.shape[1], x_ref.shape[2]
    pad = K // 2
    f32 = jnp.float32

    lane_masks = masks_ref[...]                       # (rows, HWp), loaded once

    def tap_w(xi, t):                                 # conv along W (innermost)
        s = t - pad
        if s == 0:
            return xi
        return pltpu.roll(xi, (-s) % HWp, axis=1) * lane_masks[t:t + 1, :]

    def tap_h(xi, t):                                 # conv along H: lane shift by W
        s = t - pad
        if s == 0:
            return xi
        return pltpu.roll(xi, (-s * W) % HWp, axis=1) * lane_masks[K + t:K + t + 1, :]

    def make_tap_d():                                 # conv along D: sublane shift
        dpos = jax.lax.broadcasted_iota(jnp.int32, (Dp, HWp), 0)
        d_masks = {}
        for t in range(K):
            s = t - pad
            if s != 0:
                d_masks[t] = ((dpos + s >= 0) & (dpos + s < D)).astype(f32)

        def tap_d(xi, t):
            s = t - pad
            if s == 0:
                return xi
            return pltpu.roll(xi, (-s) % Dp, axis=0) * d_masks[t]
        return tap_d

    def conv_pass(read, dst_ref, w_ref, b_ref, tap):
        # acc[o] = b[o] + sum_{i,t} w[o,i,t] * shift_t(in[i]).
        # Shift+mask computed once per (i, t); reused for every output channel.
        acc = [jnp.broadcast_to(b_ref[o], (Dp, HWp)) for o in range(C)]
        for i in range(C):
            xi = read(i)                              # per-channel load/cast, once
            for t in range(K):
                xit = tap(xi, t)                      # roll (XLU) + mask mul, once
                for o in range(C):
                    acc[o] = acc[o] + w_ref[(o * C + i) * K + t] * xit
        for o in range(C):
            dst_ref[o] = acc[o].astype(dst_ref.dtype)

    read_x = lambda i: x_ref[i].astype(f32)
    if out_is_f32:
        # Ping-pong through the f32 output block: pass1 -> o, pass2 -> t1,
        # pass3 -> o.  Saves one full-volume scratch (matters on v7x VMEM).
        (t1_ref,) = scratch_refs
        conv_pass(read_x, o_ref, w1_ref, b1_ref, tap_w)                       # (1,1,K)
        conv_pass(lambda i: o_ref[i], t1_ref, w2_ref, b2_ref, tap_h)          # (1,K,1)
        conv_pass(lambda i: t1_ref[i], o_ref, w3_ref, b3_ref, make_tap_d())   # (K,1,1)
    else:
        t1_ref, t2_ref = scratch_refs                 # intermediates stay f32
        conv_pass(read_x, t1_ref, w1_ref, b1_ref, tap_w)
        conv_pass(lambda i: t1_ref[i], t2_ref, w2_ref, b2_ref, tap_h)
        conv_pass(lambda i: t2_ref[i], o_ref, w3_ref, b3_ref, make_tap_d())


def _vmem_cap_bytes():
    try:
        return int(pltpu.get_tpu_info().vmem_capacity_bytes)
    except Exception:
        return 64 << 20            # conservative fallback: v7x per-TC VMEM


def striped_conv3d(x, params):
    """Pallas forward of StripedConv3D on an NCDHW tensor (odd kernel size)."""
    N, C, D, H, W = x.shape
    (w1, b1), (w2, b2), (w3, b3) = params
    K = w1.shape[-1]
    assert K % 2 == 1, "StripedConv3D Pallas kernel requires an odd kernel_size"
    pad = K // 2

    HW = H * W
    HWp = ((HW + 127) // 128) * 128          # lane-dense last dim
    Dp = ((D + 7) // 8) * 8                  # sublane-dense D

    x4 = x.reshape(N, C, D, HW)              # free reshape, no HBM copy
    needs_pad = (HWp != HW) or (Dp != D)
    if needs_pad:
        x4 = jnp.pad(x4, ((0, 0), (0, 0), (0, Dp - D), (0, HWp - HW)))

    # 0/1 f32 boundary masks for the W- and H-conv taps (one row per tap),
    # built on the XLA side so `% W` never runs on the VPU.
    lane = jnp.arange(HWp, dtype=jnp.int32)
    wpos, hpos = lane % W, lane // W
    s = jnp.arange(K, dtype=jnp.int32)[:, None] - pad               # (K, 1)
    w_valid = (wpos[None, :] + s >= 0) & (wpos[None, :] + s < W)
    h_valid = (hpos[None, :] + s >= 0) & (hpos[None, :] + s < H)
    masks = jnp.concatenate([w_valid, h_valid], axis=0).astype(jnp.float32)
    rows = ((2 * K + 7) // 8) * 8
    masks = jnp.pad(masks, ((0, rows - 2 * K), (0, 0)))

    flat = lambda a: jnp.asarray(a, jnp.float32).reshape(-1)

    out_is_f32 = jnp.dtype(x.dtype) == jnp.float32
    n_scratch = 1 if out_is_f32 else 2

    kernel = functools.partial(_fused_striped_kernel, C=C, K=K, W=W, D=D,
                               out_is_f32=out_is_f32)

    # VMEM budget: double-buffered in+out blocks + f32 scratch volume(s),
    # capped at 3/4 of this chip's physical VMEM (~96 MiB on v5e/v6e,
    # ~48 MiB on v7x).
    itemsize = jnp.dtype(x.dtype).itemsize
    blk_io = C * Dp * HWp * itemsize
    blk_f32 = C * Dp * HWp * 4
    need = 4 * blk_io + n_scratch * blk_f32 + (2 << 20)
    vmem_limit = int(min(max(need, 32 << 20), (_vmem_cap_bytes() * 3) // 4))

    vol_spec = pl.BlockSpec((None, C, Dp, HWp), lambda n: (n, 0, 0, 0))
    msk_spec = pl.BlockSpec((rows, HWp), lambda n: (0, 0))
    smem_spec = pl.BlockSpec(memory_space=pltpu.MemorySpace.SMEM)

    y4 = pl.pallas_call(
        kernel,
        out_shape=jax.ShapeDtypeStruct((N, C, Dp, HWp), x.dtype),
        grid_spec=pltpu.PrefetchScalarGridSpec(
            num_scalar_prefetch=0,
            grid=(N,),
            in_specs=[vol_spec, msk_spec,
                      smem_spec, smem_spec,     # w1, b1
                      smem_spec, smem_spec,     # w2, b2
                      smem_spec, smem_spec],    # w3, b3
            out_specs=vol_spec,
            scratch_shapes=[pltpu.VMEM((C, Dp, HWp), jnp.float32)] * n_scratch),
        compiler_params=pltpu.CompilerParams(
            dimension_semantics=("parallel",),   # batch splits across v7x's 2 TCs
            vmem_limit_bytes=vmem_limit),
    )(x4, masks, flat(w1), flat(b1), flat(w2), flat(b2), flat(w3), flat(b3))

    if needs_pad:
        y4 = y4[:, :, :D, :HW]
    return y4.reshape(N, C, D, H, W)


def init_params(key, in_ch, kernel_size):
    """Deterministic torch-like (kaiming-uniform-ish) init.
    Each conv: weight (Cout, Cin, K) (singleton kernel dims squeezed), bias (Cout,)."""
    K = kernel_size
    fan_in = in_ch * K
    bound = 1.0 / math.sqrt(fan_in)
    keys = jax.random.split(key, 6)
    params = []
    for i in range(3):
        w = jax.random.uniform(keys[2 * i], (in_ch, in_ch, K),
                               jnp.float32, -bound, bound)
        b = jax.random.uniform(keys[2 * i + 1], (in_ch,),
                               jnp.float32, -bound, bound)
        params.append((w, b))
    return params


def ref_striped_conv3d(x, params, kernel_size):
    """Pure-JAX/XLA reference matching torch.nn.Conv3d semantics (NCDHW)."""
    pad = kernel_size // 2
    (w1, b1), (w2, b2), (w3, b3) = params

    def conv(y, w5, b, padding):
        out = jax.lax.conv_general_dilated(
            y, w5, window_strides=(1, 1, 1), padding=padding,
            dimension_numbers=('NCDHW', 'OIDHW', 'NCDHW'))
        return out + b[None, :, None, None, None]

    y = conv(x, w1[:, :, None, None, :], b1, [(0, 0), (0, 0), (pad, pad)])
    y = conv(y, w2[:, :, None, :, None], b2, [(0, 0), (pad, pad), (0, 0)])
    y = conv(y, w3[:, :, :, None, None], b3, [(pad, pad), (0, 0), (0, 0)])
    return y


if __name__ == "__main__":
    key = jax.random.PRNGKey(0)

    cases = [
        # (N, C, D, H, W, kernel_size)
        (2, 4, 8, 8, 8, 3),     # HW=64 -> padded to 128 lanes, D already 8
        (1, 4, 5, 16, 9, 3),    # ragged: D=5 -> 8 sublanes, HW=144 -> 256 lanes
    ]
    for idx, (N, C, D, H, W, K) in enumerate(cases):
        kx, kp = jax.random.split(jax.random.fold_in(key, idx))
        x = jax.random.normal(kx, (N, C, D, H, W), jnp.float32)   # NCDHW
        params = init_params(kp, C, K)

        y = jax.block_until_ready(striped_conv3d(x, params))
        y_ref = jax.block_until_ready(ref_striped_conv3d(x, params, K))

        assert y.shape == x.shape
        err = float(jnp.max(jnp.abs(y - y_ref)))
        assert jnp.allclose(y, y_ref, atol=1e-4, rtol=1e-4), (
            f"case {idx}: mismatch vs XLA reference (max |err| = {err})")

    print("KERNEL_OK")
</pallas_src>

<mosaic_0001>
module attributes {stable_mosaic.version = 11 : i64} {
  func.func @_fused_striped_kernel(%arg0: i32, %arg1: memref<1x4x8x128xf32, #tpu.memory_space<vmem>>, %arg2: memref<8x128xf32, #tpu.memory_space<vmem>>, %arg3: memref<48xf32, #tpu.memory_space<smem>>, %arg4: memref<4xf32, #tpu.memory_space<smem>>, %arg5: memref<48xf32, #tpu.memory_space<smem>>, %arg6: memref<4xf32, #tpu.memory_space<smem>>, %arg7: memref<48xf32, #tpu.memory_space<smem>>, %arg8: memref<4xf32, #tpu.memory_space<smem>>, %arg9: memref<1x4x8x128xf32, #tpu.memory_space<vmem>>, %arg10: memref<4x8x128xf32, #tpu.memory_space<vmem>>) attributes {dimension_semantics = [#tpu.dimension_semantics<parallel>], iteration_bounds = array<i64: 2>, scalar_prefetch = 0 : i64, scratch_operands = 1 : i64, tpu.core_type = #tpu.core_type<tc>, window_params = [{transform_indices = @transform_0, window_bounds = array<i64: 1, 4, 8, 128>}, {pipeline_mode = #tpu.pipeline_mode<synchronous>, transform_indices = @transform_1, window_bounds = array<i64: 8, 128>}, {transform_indices = @transform_2, window_bounds = array<i64: 48>}, {transform_indices = @transform_3, window_bounds = array<i64: 4>}, {transform_indices = @transform_4, window_bounds = array<i64: 48>}, {transform_indices = @transform_5, window_bounds = array<i64: 4>}, {transform_indices = @transform_6, window_bounds = array<i64: 48>}, {transform_indices = @transform_7, window_bounds = array<i64: 4>}, {transform_indices = @transform_8, window_bounds = array<i64: 1, 4, 8, 128>}]} {
    %c0 = arith.constant 0 : index
    %c0_0 = arith.constant 0 : index
    %0 = vector.load %arg2[%c0, %c0_0] : memref<8x128xf32, #tpu.memory_space<vmem>>, vector<8x128xf32>
    %c0_1 = arith.constant 0 : index
    %1 = memref.load %arg4[%c0_1] : memref<4xf32, #tpu.memory_space<smem>>
    %2 = vector.broadcast %1 : f32 to vector<8x128xf32>
    %c1 = arith.constant 1 : index
    %3 = memref.load %arg4[%c1] : memref<4xf32, #tpu.memory_space<smem>>
    %4 = vector.broadcast %3 : f32 to vector<8x128xf32>
    %c2 = arith.constant 2 : index
    %5 = memref.load %arg4[%c2] : memref<4xf32, #tpu.memory_space<smem>>
    %6 = vector.broadcast %5 : f32 to vector<8x128xf32>
    %c3 = arith.constant 3 : index
    %7 = memref.load %arg4[%c3] : memref<4xf32, #tpu.memory_space<smem>>
    %8 = vector.broadcast %7 : f32 to vector<8x128xf32>
    %c0_2 = arith.constant 0 : index
    %c0_3 = arith.constant 0 : index
    %c0_4 = arith.constant 0 : index
    %c0_5 = arith.constant 0 : index
    %9 = vector.load %arg1[%c0_2, %c0_3, %c0_4, %c0_5] : memref<1x4x8x128xf32, #tpu.memory_space<vmem>>, vector<1x1x8x128xf32>
    %10 = vector.shape_cast %9 : vector<1x1x8x128xf32> to vector<8x128xf32>
    %c1_i32 = arith.constant 1 : i32
    %11 = tpu.dynamic_rotate %10 by %c1_i32 dim 1 : vector<8x128xf32>, i32 -> vector<8x128xf32>
    %12 = vector.extract_strided_slice %0 {offsets = [0, 0], sizes = [1, 128], strides = [1, 1]} : vector<8x128xf32> to vector<1x128xf32>
    %13 = vector.broadcast %12 : vector<1x128xf32> to vector<8x128xf32>
    %14 = arith.mulf %11, %13 : vector<8x128xf32>
    %c0_6 = arith.constant 0 : index
    %15 = memref.load %arg3[%c0_6] : memref<48xf32, #tpu.memory_space<smem>>
    %16 = vector.broadcast %15 : f32 to vector<8x128xf32>
    %17 = arith.mulf %16, %14 : vector<8x128xf32>
    %18 = arith.addf %2, %17 : vector<8x128xf32>
    %c12 = arith.constant 12 : index
    %19 = memref.load %arg3[%c12] : memref<48xf32, #tpu.memory_space<smem>>
    %20 = vector.broadcast %19 : f32 to vector<8x128xf32>
    %21 = arith.mulf %20, %14 : vector<8x128xf32>
    %22 = arith.addf %4, %21 : vector<8x128xf32>
    %c24 = arith.constant 24 : index
    %23 = memref.load %arg3[%c24] : memref<48xf32, #tpu.memory_space<smem>>
    %24 = vector.broadcast %23 : f32 to vector<8x128xf32>
    %25 = arith.mulf %24, %14 : vector<8x128xf32>
    %26 = arith.addf %6, %25 : vector<8x128xf32>
    %c36 = arith.constant 36 : index
    %27 = memref.load %arg3[%c36] : memref<48xf32, #tpu.memory_space<smem>>
    %28 = vector.broadcast %27 : f32 to vector<8x128xf32>
    %29 = arith.mulf %28, %14 : vector<8x128xf32>
    %30 = arith.addf %8, %29 : vector<8x128xf32>
    %c1_7 = arith.constant 1 : index
    %31 = memref.load %arg3[%c1_7] : memref<48xf32, #tpu.memory_space<smem>>
    %32 = vector.broadcast %31 : f32 to vector<8x128xf32>
    %33 = arith.mulf %32, %10 : vector<8x128xf32>
    %34 = arith.addf %18, %33 : vector<8x128xf32>
    %c13 = arith.constant 13 : index
    %35 = memref.load %arg3[%c13] : memref<48xf32, #tpu.memory_space<smem>>
    %36 = vector.broadcast %35 : f32 to vector<8x128xf32>
    %37 = arith.mulf %36, %10 : vector<8x128xf32>
    %38 = arith.addf %22, %37 : vector<8x128xf32>
    %c25 = arith.constant 25 : index
    %39 = memref.load %arg3[%c25] : memref<48xf32, #tpu.memory_space<smem>>
    %40 = vector.broadcast %39 : f32 to vector<8x128xf32>
    %41 = arith.mulf %40, %10 : vector<8x128xf32>
    %42 = arith.addf %26, %41 : vector<8x128xf32>
    %c37 = arith.constant 37 : index
    %43 = memref.load %arg3[%c37] : memref<48xf32, #tpu.memory_space<smem>>
    %44 = vector.broadcast %43 : f32 to vector<8x128xf32>
    %45 = arith.mulf %44, %10 : vector<8x128xf32>
    %46 = arith.addf %30, %45 : vector<8x128xf32>
    %c127_i32 = arith.constant 127 : i32
    %47 = tpu.dynamic_rotate %10 by %c127_i32 dim 1 : vector<8x128xf32>, i32 -> vector<8x128xf32>
    %48 = vector.extract_strided_slice %0 {offsets = [2, 0], sizes = [1, 128], strides = [1, 1]} : vector<8x128xf32> to vector<1x128xf32>
    %49 = vector.broadcast %48 : vector<1x128xf32> to vector<8x128xf32>
    %50 = arith.mulf %47, %49 : vector<8x128xf32>
    %c2_8 = arith.constant 2 : index
    %51 = memref.load %arg3[%c2_8] : memref<48xf32, #tpu.memory_space<smem>>
    %52 = vector.broadcast %51 : f32 to vector<8x128xf32>
    %53 = arith.mulf %52, %50 : vector<8x128xf32>
    %54 = arith.addf %34, %53 : vector<8x128xf32>
    %c14 = arith.constant 14 : index
    %55 = memref.load %arg3[%c14] : memref<48xf32, #tpu.memory_space<smem>>
    %56 = vector.broadcast %55 : f32 to vector<8x128xf32>
    %57 = arith.mulf %56, %50 : vector<8x128xf32>
    %58 = arith.addf %38, %57 : vector<8x128xf32>
    %c26 = arith.constant 26 : index
    %59 = memref.load %arg3[%c26] : memref<48xf32, #tpu.memory_space<smem>>
    %60 = vector.broadcast %59 : f32 to vector<8x128xf32>
    %61 = arith.mulf %60, %50 : vector<8x128xf32>
    %62 = arith.addf %42, %61 : vector<8x128xf32>
    %c38 = arith.constant 38 : index
    %63 = memref.load %arg3[%c38] : memref<48xf32, #tpu.memory_space<smem>>
    %64 = vector.broadcast %63 : f32 to vector<8x128xf32>
    %65 = arith.mulf %64, %50 : vector<8x128xf32>
    %66 = arith.addf %46, %65 : vector<8x128xf32>
    %c0_9 = arith.constant 0 : index
    %c1_10 = arith.constant 1 : index
    %c0_11 = arith.constant 0 : index
    %c0_12 = arith.constant 0 : index
    %67 = vector.load %arg1[%c0_9, %c1_10, %c0_11, %c0_12] : memref<1x4x8x128xf32, #tpu.memory_space<vmem>>, vector<1x1x8x128xf32>
    %68 = vector.shape_cast %67 : vector<1x1x8x128xf32> to vector<8x128xf32>
    %c1_i32_13 = arith.constant 1 : i32
    %69 = tpu.dynamic_rotate %68 by %c1_i32_13 dim 1 : vector<8x128xf32>, i32 -> vector<8x128xf32>
    %70 = vector.extract_strided_slice %0 {offsets = [0, 0], sizes = [1, 128], strides = [1, 1]} : vector<8x128xf32> to vector<1x128xf32>
    %71 = vector.broadcast %70 : vector<1x128xf32> to vector<8x128xf32>
    %72 = arith.mulf %69, %71 : vector<8x128xf32>
    %c3_14 = arith.constant 3 : index
    %73 = memref.load %arg3[%c3_14] : memref<48xf32, #tpu.memory_space<smem>>
    %74 = vector.broadcast %73 : f32 to vector<8x128xf32>
    %75 = arith.mulf %74, %72 : vector<8x128xf32>
    %76 = arith.addf %54, %75 : vector<8x128xf32>
    %c15 = arith.constant 15 : index
    %77 = memref.load %arg3[%c15] : memref<48xf32, #tpu.memory_space<smem>>
    %78 = vector.broadcast %77 : f32 to vector<8x128xf32>
    %79 = arith.mulf %78, %72 : vector<8x128xf32>
    %80 = arith.addf %58, %79 : vector<8x128xf32>
    %c27 = arith.constant 27 : index
    %81 = memref.load %arg3[%c27] : memref<48xf32, #tpu.memory_space<smem>>
    %82 = vector.broadcast %81 : f32 to vector<8x128xf32>
    %83 = arith.mulf %82, %72 : vector<8x128xf32>
    %84 = arith.addf %62, %83 : vector<8x128xf32>
    %c39 = arith.constant 39 : index
    %85 = memref.load %arg3[%c39] : memref<48xf32, #tpu.memory_space<smem>>
    %86 = vector.broadcast %85 : f32 to vector<8x128xf32>
    %87 = arith.mulf %86, %72 : vector<8x128xf32>
    %88 = arith.addf %66, %87 : vector<8x128xf32>
    %c4 = arith.constant 4 : index
    %89 = memref.load %arg3[%c4] : memref<48xf32, #tpu.memory_space<smem>>
    %90 = vector.broadcast %89 : f32 to vector<8x128xf32>
    %91 = arith.mulf %90, %68 : vector<8x128xf32>
    %92 = arith.addf %76, %91 : vector<8x128xf32>
    %c16 = arith.constant 16 : index
    %93 = memref.load %arg3[%c16] : memref<48xf32, #tpu.memory_space<smem>>
    %94 = vector.broadcast %93 : f32 to vector<8x128xf32>
    %95 = arith.mulf %94, %68 : vector<8x128xf32>
    %96 = arith.addf %80, %95 : vector<8x128xf32>
    %c28 = arith.constant 28 : index
    %97 = memref.load %arg3[%c28] : memref<48xf32, #tpu.memory_space<smem>>
    %98 = vector.broadcast %97 : f32 to vector<8x128xf32>
    %99 = arith.mulf %98, %68 : vector<8x128xf32>
    %100 = arith.addf %84, %99 : vector<8x128xf32>
    %c40 = arith.constant 40 : index
    %101 = memref.load %arg3[%c40] : memref<48xf32, #tpu.memory_space<smem>>
    %102 = vector.broadcast %101 : f32 to vector<8x128xf32>
    %103 = arith.mulf %102, %68 : vector<8x128xf32>
    %104 = arith.addf %88, %103 : vector<8x128xf32>
    %c127_i32_15 = arith.constant 127 : i32
    %105 = tpu.dynamic_rotate %68 by %c127_i32_15 dim 1 : vector<8x128xf32>, i32 -> vector<8x128xf32>
    %106 = vector.extract_strided_slice %0 {offsets = [2, 0], sizes = [1, 128], strides = [1, 1]} : vector<8x128xf32> to vector<1x128xf32>
    %107 = vector.broadcast %106 : vector<1x128xf32> to vector<8x128xf32>
    %108 = arith.mulf %105, %107 : vector<8x128xf32>
    %c5 = arith.constant 5 : index
    %109 = memref.load %arg3[%c5] : memref<48xf32, #tpu.memory_space<smem>>
    %110 = vector.broadcast %109 : f32 to vector<8x128xf32>
    %111 = arith.mulf %110, %108 : vector<8x128xf32>
    %112 = arith.addf %92, %111 : vector<8x128xf32>
    %c17 = arith.constant 17 : index
    %113 = memref.load %arg3[%c17] : memref<48xf32, #tpu.memory_space<smem>>
    %114 = vector.broadcast %113 : f32 to vector<8x128xf32>
    %115 = arith.mulf %114, %108 : vector<8x128xf32>
    %116 = arith.addf %96, %115 : vector<8x128xf32>
    %c29 = arith.constant 29 : index
    %117 = memref.load %arg3[%c29] : memref<48xf32, #tpu.memory_space<smem>>
    %118 = vector.broadcast %117 : f32 to vector<8x128xf32>
    %119 = arith.mulf %118, %108 : vector<8x128xf32>
    %120 = arith.addf %100, %119 : vector<8x128xf32>
    %c41 = arith.constant 41 : index
    %121 = memref.load %arg3[%c41] : memref<48xf32, #tpu.memory_space<smem>>
    %122 = vector.broadcast %121 : f32 to vector<8x128xf32>
    %123 = arith.mulf %122, %108 : vector<8x128xf32>
    %124 = arith.addf %104, %123 : vector<8x128xf32>
    %c0_16 = arith.constant 0 : index
    %c2_17 = arith.constant 2 : index
    %c0_18 = arith.constant 0 : index
    %c0_19 = arith.constant 0 : index
    %125 = vector.load %arg1[%c0_16, %c2_17, %c0_18, %c0_19] : memref<1x4x8x128xf32, #tpu.memory_space<vmem>>, vector<1x1x8x128xf32>
    %126 = vector.shape_cast %125 : vector<1x1x8x128xf32> to vector<8x128xf32>
    %c1_i32_20 = arith.constant 1 : i32
    %127 = tpu.dynamic_rotate %126 by %c1_i32_20 dim 1 : vector<8x128xf32>, i32 -> vector<8x128xf32>
    %128 = vector.extract_strided_slice %0 {offsets = [0, 0], sizes = [1, 128], strides = [1, 1]} : vector<8x128xf32> to vector<1x128xf32>
    %129 = vector.broadcast %128 : vector<1x128xf32> to vector<8x128xf32>
    %130 = arith.mulf %127, %129 : vector<8x128xf32>
    %c6 = arith.constant 6 : index
    %131 = memref.load %arg3[%c6] : memref<48xf32, #tpu.memory_space<smem>>
    %132 = vector.broadcast %131 : f32 to vector<8x128xf32>
    %133 = arith.mulf %132, %130 : vector<8x128xf32>
    %134 = arith.addf %112, %133 : vector<8x128xf32>
    %c18 = arith.constant 18 : index
    %135 = memref.load %arg3[%c18] : memref<48xf32, #tpu.memory_space<smem>>
    %136 = vector.broadcast %135 : f32 to vector<8x128xf32>
    %137 = arith.mulf %136, %130 : vector<8x128xf32>
    %138 = arith.addf %116, %137 : vector<8x128xf32>
    %c30 = arith.constant 30 : index
    %139 = memref.load %arg3[%c30] : memref<48xf32, #tpu.memory_space<smem>>
    %140 = vector.broadcast %139 : f32 to vector<8x128xf32>
    %141 = arith.mulf %140, %130 : vector<8x128xf32>
    %142 = arith.addf %120, %141 : vector<8x128xf32>
    %c42 = arith.constant 42 : index
    %143 = memref.load %arg3[%c42] : memref<48xf32, #tpu.memory_space<smem>>
    %144 = vector.broadcast %143 : f32 to vector<8x128xf32>
    %145 = arith.mulf %144, %130 : vector<8x128xf32>
    %146 = arith.addf %124, %145 : vector<8x128xf32>
    %c7 = arith.constant 7 : index
    %147 = memref.load %arg3[%c7] : memref<48xf32, #tpu.memory_space<smem>>
    %148 = vector.broadcast %147 : f32 to vector<8x128xf32>
    %149 = arith.mulf %148, %126 : vector<8x128xf32>
    %150 = arith.addf %134, %149 : vector<8x128xf32>
    %c19 = arith.constant 19 : index
    %151 = memref.load %arg3[%c19] : memref<48xf32, #tpu.memory_space<smem>>
    %152 = vector.broadcast %151 : f32 to vector<8x128xf32>
    %153 = arith.mulf %152, %126 : vector<8x128xf32>
    %154 = arith.addf %138, %153 : vector<8x128xf32>
    %c31 = arith.constant 31 : index
    %155 = memref.load %arg3[%c31] : memref<48xf32, #tpu.memory_space<smem>>
    %156 = vector.broadcast %155 : f32 to vector<8x128xf32>
    %157 = arith.mulf %156, %126 : vector<8x128xf32>
    %158 = arith.addf %142, %157 : vector<8x128xf32>
    %c43 = arith.constant 43 : index
    %159 = memref.load %arg3[%c43] : memref<48xf32, #tpu.memory_space<smem>>
    %160 = vector.broadcast %159 : f32 to vector<8x128xf32>
    %161 = arith.mulf %160, %126 : vector<8x128xf32>
    %162 = arith.addf %146, %161 : vector<8x128xf32>
    %c127_i32_21 = arith.constant 127 : i32
    %163 = tpu.dynamic_rotate %126 by %c127_i32_21 dim 1 : vector<8x128xf32>, i32 -> vector<8x128xf32>
    %164 = vector.extract_strided_slice %0 {offsets = [2, 0], sizes = [1, 128], strides = [1, 1]} : vector<8x128xf32> to vector<1x128xf32>
    %165 = vector.broadcast %164 : vector<1x128xf32> to vector<8x128xf32>
    %166 = arith.mulf %163, %165 : vector<8x128xf32>
    %c8 = arith.constant 8 : index
    %167 = memref.load %arg3[%c8] : memref<48xf32, #tpu.memory_space<smem>>
    %168 = vector.broadcast %167 : f32 to vector<8x128xf32>
    %169 = arith.mulf %168, %166 : vector<8x128xf32>
    %170 = arith.addf %150, %169 : vector<8x128xf32>
    %c20 = arith.constant 20 : index
    %171 = memref.load %arg3[%c20] : memref<48xf32, #tpu.memory_space<smem>>
    %172 = vector.broadcast %171 : f32 to vector<8x128xf32>
    %173 = arith.mulf %172, %166 : vector<8x128xf32>
    %174 = arith.addf %154, %173 : vector<8x128xf32>
    %c32 = arith.constant 32 : index
    %175 = memref.load %arg3[%c32] : memref<48xf32, #tpu.memory_space<smem>>
    %176 = vector.broadcast %175 : f32 to vector<8x128xf32>
    %177 = arith.mulf %176, %166 : vector<8x128xf32>
    %178 = arith.addf %158, %177 : vector<8x128xf32>
    %c44 = arith.constant 44 : index
    %179 = memref.load %arg3[%c44] : memref<48xf32, #tpu.memory_space<smem>>
    %180 = vector.broadcast %179 : f32 to vector<8x128xf32>
    %181 = arith.mulf %180, %166 : vector<8x128xf32>
    %182 = arith.addf %162, %181 : vector<8x128xf32>
    %c0_22 = arith.constant 0 : index
    %c3_23 = arith.constant 3 : index
    %c0_24 = arith.constant 0 : index
    %c0_25 = arith.constant 0 : index
    %183 = vector.load %arg1[%c0_22, %c3_23, %c0_24, %c0_25] : memref<1x4x8x128xf32, #tpu.memory_space<vmem>>, vector<1x1x8x128xf32>
    %184 = vector.shape_cast %183 : vector<1x1x8x128xf32> to vector<8x128xf32>
    %c1_i32_26 = arith.constant 1 : i32
    %185 = tpu.dynamic_rotate %184 by %c1_i32_26 dim 1 : vector<8x128xf32>, i32 -> vector<8x128xf32>
    %186 = vector.extract_strided_slice %0 {offsets = [0, 0], sizes = [1, 128], strides = [1, 1]} : vector<8x128xf32> to vector<1x128xf32>
    %187 = vector.broadcast %186 : vector<1x128xf32> to vector<8x128xf32>
    %188 = arith.mulf %185, %187 : vector<8x128xf32>
    %c9 = arith.constant 9 : index
    %189 = memref.load %arg3[%c9] : memref<48xf32, #tpu.memory_space<smem>>
    %190 = vector.broadcast %189 : f32 to vector<8x128xf32>
    %191 = arith.mulf %190, %188 : vector<8x128xf32>
    %192 = arith.addf %170, %191 : vector<8x128xf32>
    %c21 = arith.constant 21 : index
    %193 = memref.load %arg3[%c21] : memref<48xf32, #tpu.memory_space<smem>>
    %194 = vector.broadcast %193 : f32 to vector<8x128xf32>
    %195 = arith.mulf %194, %188 : vector<8x128xf32>
    %196 = arith.addf %174, %195 : vector<8x128xf32>
    %c33 = arith.constant 33 : index
    %197 = memref.load %arg3[%c33] : memref<48xf32, #tpu.memory_space<smem>>
    %198 = vector.broadcast %197 : f32 to vector<8x128xf32>
    %199 = arith.mulf %198, %188 : vector<8x128xf32>
    %200 = arith.addf %178, %199 : vector<8x128xf32>
    %c45 = arith.constant 45 : index
    %201 = memref.load %arg3[%c45] : memref<48xf32, #tpu.memory_space<smem>>
    %202 = vector.broadcast %201 : f32 to vector<8x128xf32>
    %203 = arith.mulf %202, %188 : vector<8x128xf32>
    %204 = arith.addf %182, %203 : vector<8x128xf32>
    %c10 = arith.constant 10 : index
    %205 = memref.load %arg3[%c10] : memref<48xf32, #tpu.memory_space<smem>>
    %206 = vector.broadcast %205 : f32 to vector<8x128xf32>
    %207 = arith.mulf %206, %184 : vector<8x128xf32>
    %208 = arith.addf %192, %207 : vector<8x128xf32>
    %c22 = arith.constant 22 : index
    %209 = memref.load %arg3[%c22] : memref<48xf32, #tpu.memory_space<smem>>
    %210 = vector.broadcast %209 : f32 to vector<8x128xf32>
    %211 = arith.mulf %210, %184 : vector<8x128xf32>
    %212 = arith.addf %196, %211 : vector<8x128xf32>
    %c34 = arith.constant 34 : index
    %213 = memref.load %arg3[%c34] : memref<48xf32, #tpu.memory_space<smem>>
    %214 = vector.broadcast %213 : f32 to vector<8x128xf32>
    %215 = arith.mulf %214, %184 : vector<8x128xf32>
    %216 = arith.addf %200, %215 : vector<8x128xf32>
    %c46 = arith.constant 46 : index
    %217 = memref.load %arg3[%c46] : memref<48xf32, #tpu.memory_space<smem>>
    %218 = vector.broadcast %217 : f32 to vector<8x128xf32>
    %219 = arith.mulf %218, %184 : vector<8x128xf32>
    %220 = arith.addf %204, %219 : vector<8x128xf32>
    %c127_i32_27 = arith.constant 127 : i32
    %221 = tpu.dynamic_rotate %184 by %c127_i32_27 dim 1 : vector<8x128xf32>, i32 -> vector<8x128xf32>
    %222 = vector.extract_strided_slice %0 {offsets = [2, 0], sizes = [1, 128], strides = [1, 1]} : vector<8x128xf32> to vector<1x128xf32>
    %223 = vector.broadcast %222 : vector<1x128xf32> to vector<8x128xf32>
    %224 = arith.mulf %221, %223 : vector<8x128xf32>
    %c11 = arith.constant 11 : index
    %225 = memref.load %arg3[%c11] : memref<48xf32, #tpu.memory_space<smem>>
    %226 = vector.broadcast %225 : f32 to vector<8x128xf32>
    %227 = arith.mulf %226, %224 : vector<8x128xf32>
    %228 = arith.addf %208, %227 : vector<8x128xf32>
    %c23 = arith.constant 23 : index
    %229 = memref.load %arg3[%c23] : memref<48xf32, #tpu.memory_space<smem>>
    %230 = vector.broadcast %229 : f32 to vector<8x128xf32>
    %231 = arith.mulf %230, %224 : vector<8x128xf32>
    %232 = arith.addf %212, %231 : vector<8x128xf32>
    %c35 = arith.constant 35 : index
    %233 = memref.load %arg3[%c35] : memref<48xf32, #tpu.memory_space<smem>>
    %234 = vector.broadcast %233 : f32 to vector<8x128xf32>
    %235 = arith.mulf %234, %224 : vector<8x128xf32>
    %236 = arith.addf %216, %235 : vector<8x128xf32>
    %c47 = arith.constant 47 : index
    %237 = memref.load %arg3[%c47] : memref<48xf32, #tpu.memory_space<smem>>
    %238 = vector.broadcast %237 : f32 to vector<8x128xf32>
    %239 = arith.mulf %238, %224 : vector<8x128xf32>
    %240 = arith.addf %220, %239 : vector<8x128xf32>
    %c0_28 = arith.constant 0 : index
    %c0_29 = arith.constant 0 : index
    %c0_30 = arith.constant 0 : index
    %c0_31 = arith.constant 0 : index
    %241 = vector.load %arg9[%c0_28, %c0_29, %c0_30, %c0_31] : memref<1x4x8x128xf32, #tpu.memory_space<vmem>>, vector<1x1x8x128xf32>
    %242 = vector.shape_cast %241 : vector<1x1x8x128xf32> to vector<8x128xf32>
    %243 = vector.shape_cast %228 : vector<8x128xf32> to vector<1x1x8x128xf32>
    tpu.vector_store %arg9[%c0_28, %c0_29, %c0_30, %c0_31], %243 {strides = array<i32>} : memref<1x4x8x128xf32, #tpu.memory_space<vmem>>, vector<1x1x8x128xf32>,
    %c0_32 = arith.constant 0 : index
    %c1_33 = arith.constant 1 : index
    %c0_34 = arith.constant 0 : index
    %c0_35 = arith.constant 0 : index
    %244 = vector.load %arg9[%c0_32, %c1_33, %c0_34, %c0_35] : memref<1x4x8x128xf32, #tpu.memory_space<vmem>>, vector<1x1x8x128xf32>
    %245 = vector.shape_cast %244 : vector<1x1x8x128xf32> to vector<8x128xf32>
    %246 = vector.shape_cast %232 : vector<8x128xf32> to vector<1x1x8x128xf32>
    tpu.vector_store %arg9[%c0_32, %c1_33, %c0_34, %c0_35], %246 {strides = array<i32>} : memref<1x4x8x128xf32, #tpu.memory_space<vmem>>, vector<1x1x8x128xf32>,
    %c0_36 = arith.constant 0 : index
    %c2_37 = arith.constant 2 : index
    %c0_38 = arith.constant 0 : index
    %c0_39 = arith.constant 0 : index
    %247 = vector.load %arg9[%c0_36, %c2_37, %c0_38, %c0_39] : memref<1x4x8x128xf32, #tpu.memory_space<vmem>>, vector<1x1x8x128xf32>
    %248 = vector.shape_cast %247 : vector<1x1x8x128xf32> to vector<8x128xf32>
    %249 = vector.shape_cast %236 : vector<8x128xf32> to vector<1x1x8x128xf32>
    tpu.vector_store %arg9[%c0_36, %c2_37, %c0_38, %c0_39], %249 {strides = array<i32>} : memref<1x4x8x128xf32, #tpu.memory_space<vmem>>, vector<1x1x8x128xf32>,
    %c0_40 = arith.constant 0 : index
    %c3_41 = arith.constant 3 : index
    %c0_42 = arith.constant 0 : index
    %c0_43 = arith.constant 0 : index
    %250 = vector.load %arg9[%c0_40, %c3_41, %c0_42, %c0_43] : memref<1x4x8x128xf32, #tpu.memory_space<vmem>>, vector<1x1x8x128xf32>
    %251 = vector.shape_cast %250 : vector<1x1x8x128xf32> to vector<8x128xf32>
    %252 = vector.shape_cast %240 : vector<8x128xf32> to vector<1x1x8x128xf32>
    tpu.vector_store %arg9[%c0_40, %c3_41, %c0_42, %c0_43], %252 {strides = array<i32>} : memref<1x4x8x128xf32, #tpu.memory_space<vmem>>, vector<1x1x8x128xf32>,
    %c0_44 = arith.constant 0 : index
    %253 = memref.load %arg6[%c0_44] : memref<4xf32, #tpu.memory_space<smem>>
    %254 = vector.broadcast %253 : f32 to vector<8x128xf32>
    %c1_45 = arith.constant 1 : index
    %255 = memref.load %arg6[%c1_45] : memref<4xf32, #tpu.memory_space<smem>>
    %256 = vector.broadcast %255 : f32 to vector<8x128xf32>
    %c2_46 = arith.constant 2 : index
    %257 = memref.load %arg6[%c2_46] : memref<4xf32, #tpu.memory_space<smem>>
    %258 = vector.broadcast %257 : f32 to vector<8x128xf32>
    %c3_47 = arith.constant 3 : index
    %259 = memref.load %arg6[%c3_47] : memref<4xf32, #tpu.memory_space<smem>>
    %260 = vector.broadcast %259 : f32 to vector<8x128xf32>
    %c0_48 = arith.constant 0 : index
    %c0_49 = arith.constant 0 : index
    %c0_50 = arith.constant 0 : index
    %c0_51 = arith.constant 0 : index
    %261 = vector.load %arg9[%c0_48, %c0_49, %c0_50, %c0_51] : memref<1x4x8x128xf32, #tpu.memory_space<vmem>>, vector<1x1x8x128xf32>
    %262 = vector.shape_cast %261 : vector<1x1x8x128xf32> to vector<8x128xf32>
    %c8_i32 = arith.constant 8 : i32
    %263 = tpu.dynamic_rotate %262 by %c8_i32 dim 1 : vector<8x128xf32>, i32 -> vector<8x128xf32>
    %264 = vector.extract_strided_slice %0 {offsets = [3, 0], sizes = [1, 128], strides = [1, 1]} : vector<8x128xf32> to vector<1x128xf32>
    %265 = vector.broadcast %264 : vector<1x128xf32> to vector<8x128xf32>
    %266 = arith.mulf %263, %265 : vector<8x128xf32>
    %c0_52 = arith.constant 0 : index
    %267 = memref.load %arg5[%c0_52] : memref<48xf32, #tpu.memory_space<smem>>
    %268 = vector.broadcast %267 : f32 to vector<8x128xf32>
    %269 = arith.mulf %268, %266 : vector<8x128xf32>
    %270 = arith.addf %254, %269 : vector<8x128xf32>
    %c12_53 = arith.constant 12 : index
    %271 = memref.load %arg5[%c12_53] : memref<48xf32, #tpu.memory_space<smem>>
    %272 = vector.broadcast %271 : f32 to vector<8x128xf32>
    %273 = arith.mulf %272, %266 : vector<8x128xf32>
    %274 = arith.addf %256, %273 : vector<8x128xf32>
    %c24_54 = arith.constant 24 : index
    %275 = memref.load %arg5[%c24_54] : memref<48xf32, #tpu.memory_space<smem>>
    %276 = vector.broadcast %275 : f32 to vector<8x128xf32>
    %277 = arith.mulf %276, %266 : vector<8x128xf32>
    %278 = arith.addf %258, %277 : vector<8x128xf32>
    %c36_55 = arith.constant 36 : index
    %279 = memref.load %arg5[%c36_55] : memref<48xf32, #tpu.memory_space<smem>>
    %280 = vector.broadcast %279 : f32 to vector<8x128xf32>
    %281 = arith.mulf %280, %266 : vector<8x128xf32>
    %282 = arith.addf %260, %281 : vector<8x128xf32>
    %c1_56 = arith.constant 1 : index
    %283 = memref.load %arg5[%c1_56] : memref<48xf32, #tpu.memory_space<smem>>
    %284 = vector.broadcast %283 : f32 to vector<8x128xf32>
    %285 = arith.mulf %284, %262 : vector<8x128xf32>
    %286 = arith.addf %270, %285 : vector<8x128xf32>
    %c13_57 = arith.constant 13 : index
    %287 = memref.load %arg5[%c13_57] : memref<48xf32, #tpu.memory_space<smem>>
    %288 = vector.broadcast %287 : f32 to vector<8x128xf32>
    %289 = arith.mulf %288, %262 : vector<8x128xf32>
    %290 = arith.addf %274, %289 : vector<8x128xf32>
    %c25_58 = arith.constant 25 : index
    %291 = memref.load %arg5[%c25_58] : memref<48xf32, #tpu.memory_space<smem>>
    %292 = vector.broadcast %291 : f32 to vector<8x128xf32>
    %293 = arith.mulf %292, %262 : vector<8x128xf32>
    %294 = arith.addf %278, %293 : vector<8x128xf32>
    %c37_59 = arith.constant 37 : index
    %295 = memref.load %arg5[%c37_59] : memref<48xf32, #tpu.memory_space<smem>>
    %296 = vector.broadcast %295 : f32 to vector<8x128xf32>
    %297 = arith.mulf %296, %262 : vector<8x128xf32>
    %298 = arith.addf %282, %297 : vector<8x128xf32>
    %c120_i32 = arith.constant 120 : i32
    %299 = tpu.dynamic_rotate %262 by %c120_i32 dim 1 : vector<8x128xf32>, i32 -> vector<8x128xf32>
    %300 = vector.extract_strided_slice %0 {offsets = [5, 0], sizes = [1, 128], strides = [1, 1]} : vector<8x128xf32> to vector<1x128xf32>
    %301 = vector.broadcast %300 : vector<1x128xf32> to vector<8x128xf32>
    %302 = arith.mulf %299, %301 : vector<8x128xf32>
    %c2_60 = arith.constant 2 : index
    %303 = memref.load %arg5[%c2_60] : memref<48xf32, #tpu.memory_space<smem>>
    %304 = vector.broadcast %303 : f32 to vector<8x128xf32>
    %305 = arith.mulf %304, %302 : vector<8x128xf32>
    %306 = arith.addf %286, %305 : vector<8x128xf32>
    %c14_61 = arith.constant 14 : index
    %307 = memref.load %arg5[%c14_61] : memref<48xf32, #tpu.memory_space<smem>>
    %308 = vector.broadcast %307 : f32 to vector<8x128xf32>
    %309 = arith.mulf %308, %302 : vector<8x128xf32>
    %310 = arith.addf %290, %309 : vector<8x128xf32>
    %c26_62 = arith.constant 26 : index
    %311 = memref.load %arg5[%c26_62] : memref<48xf32, #tpu.memory_space<smem>>
    %312 = vector.broadcast %311 : f32 to vector<8x128xf32>
    %313 = arith.mulf %312, %302 : vector<8x128xf32>
    %314 = arith.addf %294, %313 : vector<8x128xf32>
    %c38_63 = arith.constant 38 : index
    %315 = memref.load %arg5[%c38_63] : memref<48xf32, #tpu.memory_space<smem>>
    %316 = vector.broadcast %315 : f32 to vector<8x128xf32>
    %317 = arith.mulf %316, %302 : vector<8x128xf32>
    %318 = arith.addf %298, %317 : vector<8x128xf32>
    %c0_64 = arith.constant 0 : index
    %c1_65 = arith.constant 1 : index
    %c0_66 = arith.constant 0 : index
    %c0_67 = arith.constant 0 : index
    %319 = vector.load %arg9[%c0_64, %c1_65, %c0_66, %c0_67] : memref<1x4x8x128xf32, #tpu.memory_space<vmem>>, vector<1x1x8x128xf32>
    %320 = vector.shape_cast %319 : vector<1x1x8x128xf32> to vector<8x128xf32>
    %c8_i32_68 = arith.constant 8 : i32
    %321 = tpu.dynamic_rotate %320 by %c8_i32_68 dim 1 : vector<8x128xf32>, i32 -> vector<8x128xf32>
    %322 = vector.extract_strided_slice %0 {offsets = [3, 0], sizes = [1, 128], strides = [1, 1]} : vector<8x128xf32> to vector<1x128xf32>
    %323 = vector.broadcast %322 : vector<1x128xf32> to vector<8x128xf32>
    %324 = arith.mulf %321, %323 : vector<8x128xf32>
    %c3_69 = arith.constant 3 : index
    %325 = memref.load %arg5[%c3_69] : memref<48xf32, #tpu.memory_space<smem>>
    %326 = vector.broadcast %325 : f32 to vector<8x128xf32>
    %327 = arith.mulf %326, %324 : vector<8x128xf32>
    %328 = arith.addf %306, %327 : vector<8x128xf32>
    %c15_70 = arith.constant 15 : index
    %329 = memref.load %arg5[%c15_70] : memref<48xf32, #tpu.memory_space<smem>>
    %330 = vector.broadcast %329 : f32 to vector<8x128xf32>
    %331 = arith.mulf %330, %324 : vector<8x128xf32>
    %332 = arith.addf %310, %331 : vector<8x128xf32>
    %c27_71 = arith.constant 27 : index
    %333 = memref.load %arg5[%c27_71] : memref<48xf32, #tpu.memory_space<smem>>
    %334 = vector.broadcast %333 : f32 to vector<8x128xf32>
    %335 = arith.mulf %334, %324 : vector<8x128xf32>
    %336 = arith.addf %314, %335 : vector<8x128xf32>
    %c39_72 = arith.constant 39 : index
    %337 = memref.load %arg5[%c39_72] : memref<48xf32, #tpu.memory_space<smem>>
    %338 = vector.broadcast %337 : f32 to vector<8x128xf32>
    %339 = arith.mulf %338, %324 : vector<8x128xf32>
    %340 = arith.addf %318, %339 : vector<8x128xf32>
    %c4_73 = arith.constant 4 : index
    %341 = memref.load %arg5[%c4_73] : memref<48xf32, #tpu.memory_space<smem>>
    %342 = vector.broadcast %341 : f32 to vector<8x128xf32>
    %343 = arith.mulf %342, %320 : vector<8x128xf32>
    %344 = arith.addf %328, %343 : vector<8x128xf32>
    %c16_74 = arith.constant 16 : index
    %345 = memref.load %arg5[%c16_74] : memref<48xf32, #tpu.memory_space<smem>>
    %346 = vector.broadcast %345 : f32 to vector<8x128xf32>
    %347 = arith.mulf %346, %320 : vector<8x128xf32>
    %348 = arith.addf %332, %347 : vector<8x128xf32>
    %c28_75 = arith.constant 28 : index
    %349 = memref.load %arg5[%c28_75] : memref<48xf32, #tpu.memory_space<smem>>
    %350 = vector.broadcast %349 : f32 to vector<8x128xf32>
    %351 = arith.mulf %350, %320 : vector<8x128xf32>
    %352 = arith.addf %336, %351 : vector<8x128xf32>
    %c40_76 = arith.constant 40 : index
    %353 = memref.load %arg5[%c40_76] : memref<48xf32, #tpu.memory_space<smem>>
    %354 = vector.broadcast %353 : f32 to vector<8x128xf32>
    %355 = arith.mulf %354, %320 : vector<8x128xf32>
    %356 = arith.addf %340, %355 : vector<8x128xf32>
    %c120_i32_77 = arith.constant 120 : i32
    %357 = tpu.dynamic_rotate %320 by %c120_i32_77 dim 1 : vector<8x128xf32>, i32 -> vector<8x128xf32>
    %358 = vector.extract_strided_slice %0 {offsets = [5, 0], sizes = [1, 128], strides = [1, 1]} : vector<8x128xf32> to vector<1x128xf32>
    %359 = vector.broadcast %358 : vector<1x128xf32> to vector<8x128xf32>
    %360 = arith.mulf %357, %359 : vector<8x128xf32>
    %c5_78 = arith.constant 5 : index
    %361 = memref.load %arg5[%c5_78] : memref<48xf32, #tpu.memory_space<smem>>
    %362 = vector.broadcast %361 : f32 to vector<8x128xf32>
    %363 = arith.mulf %362, %360 : vector<8x128xf32>
    %364 = arith.addf %344, %363 : vector<8x128xf32>
    %c17_79 = arith.constant 17 : index
    %365 = memref.load %arg5[%c17_79] : memref<48xf32, #tpu.memory_space<smem>>
    %366 = vector.broadcast %365 : f32 to vector<8x128xf32>
    %367 = arith.mulf %366, %360 : vector<8x128xf32>
    %368 = arith.addf %348, %367 : vector<8x128xf32>
    %c29_80 = arith.constant 29 : index
    %369 = memref.load %arg5[%c29_80] : memref<48xf32, #tpu.memory_space<smem>>
    %370 = vector.broadcast %369 : f32 to vector<8x128xf32>
    %371 = arith.mulf %370, %360 : vector<8x128xf32>
    %372 = arith.addf %352, %371 : vector<8x128xf32>
    %c41_81 = arith.constant 41 : index
    %373 = memref.load %arg5[%c41_81] : memref<48xf32, #tpu.memory_space<smem>>
    %374 = vector.broadcast %373 : f32 to vector<8x128xf32>
    %375 = arith.mulf %374, %360 : vector<8x128xf32>
    %376 = arith.addf %356, %375 : vector<8x128xf32>
    %c0_82 = arith.constant 0 : index
    %c2_83 = arith.constant 2 : index
    %c0_84 = arith.constant 0 : index
    %c0_85 = arith.constant 0 : index
    %377 = vector.load %arg9[%c0_82, %c2_83, %c0_84, %c0_85] : memref<1x4x8x128xf32, #tpu.memory_space<vmem>>, vector<1x1x8x128xf32>
    %378 = vector.shape_cast %377 : vector<1x1x8x128xf32> to vector<8x128xf32>
    %c8_i32_86 = arith.constant 8 : i32
    %379 = tpu.dynamic_rotate %378 by %c8_i32_86 dim 1 : vector<8x128xf32>, i32 -> vector<8x128xf32>
    %380 = vector.extract_strided_slice %0 {offsets = [3, 0], sizes = [1, 128], strides = [1, 1]} : vector<8x128xf32> to vector<1x128xf32>
    %381 = vector.broadcast %380 : vector<1x128xf32> to vector<8x128xf32>
    %382 = arith.mulf %379, %381 : vector<8x128xf32>
    %c6_87 = arith.constant 6 : index
    %383 = memref.load %arg5[%c6_87] : memref<48xf32, #tpu.memory_space<smem>>
    %384 = vector.broadcast %383 : f32 to vector<8x128xf32>
    %385 = arith.mulf %384, %382 : vector<8x128xf32>
    %386 = arith.addf %364, %385 : vector<8x128xf32>
    %c18_88 = arith.constant 18 : index
    %387 = memref.load %arg5[%c18_88] : memref<48xf32, #tpu.memory_space<smem>>
    %388 = vector.broadcast %387 : f32 to vector<8x128xf32>
    %389 = arith.mulf %388, %382 : vector<8x128xf32>
    %390 = arith.addf %368, %389 : vector<8x128xf32>
    %c30_89 = arith.constant 30 : index
    %391 = memref.load %arg5[%c30_89] : memref<48xf32, #tpu.memory_space<smem>>
    %392 = vector.broadcast %391 : f32 to vector<8x128xf32>
    %393 = arith.mulf %392, %382 : vector<8x128xf32>
    %394 = arith.addf %372, %393 : vector<8x128xf32>
    %c42_90 = arith.constant 42 : index
    %395 = memref.load %arg5[%c42_90] : memref<48xf32, #tpu.memory_space<smem>>
    %396 = vector.broadcast %395 : f32 to vector<8x128xf32>
    %397 = arith.mulf %396, %382 : vector<8x128xf32>
    %398 = arith.addf %376, %397 : vector<8x128xf32>
    %c7_91 = arith.constant 7 : index
    %399 = memref.load %arg5[%c7_91] : memref<48xf32, #tpu.memory_space<smem>>
    %400 = vector.broadcast %399 : f32 to vector<8x128xf32>
    %401 = arith.mulf %400, %378 : vector<8x128xf32>
    %402 = arith.addf %386, %401 : vector<8x128xf32>
    %c19_92 = arith.constant 19 : index
    %403 = memref.load %arg5[%c19_92] : memref<48xf32, #tpu.memory_space<smem>>
    %404 = vector.broadcast %403 : f32 to vector<8x128xf32>
    %405 = arith.mulf %404, %378 : vector<8x128xf32>
    %406 = arith.addf %390, %405 : vector<8x128xf32>
    %c31_93 = arith.constant 31 : index
    %407 = memref.load %arg5[%c31_93] : memref<48xf32, #tpu.memory_space<smem>>
    %408 = vector.broadcast %407 : f32 to vector<8x128xf32>
    %409 = arith.mulf %408, %378 : vector<8x128xf32>
    %410 = arith.addf %394, %409 : vector<8x128xf32>
    %c43_94 = arith.constant 43 : index
    %411 = memref.load %arg5[%c43_94] : memref<48xf32, #tpu.memory_space<smem>>
    %412 = vector.broadcast %411 : f32 to vector<8x128xf32>
    %413 = arith.mulf %412, %378 : vector<8x128xf32>
    %414 = arith.addf %398, %413 : vector<8x128xf32>
    %c120_i32_95 = arith.constant 120 : i32
    %415 = tpu.dynamic_rotate %378 by %c120_i32_95 dim 1 : vector<8x128xf32>, i32 -> vector<8x128xf32>
    %416 = vector.extract_strided_slice %0 {offsets = [5, 0], sizes = [1, 128], strides = [1, 1]} : vector<8x128xf32> to vector<1x128xf32>
    %417 = vector.broadcast %416 : vector<1x128xf32> to vector<8x128xf32>
    %418 = arith.mulf %415, %417 : vector<8x128xf32>
    %c8_96 = arith.constant 8 : index
    %419 = memref.load %arg5[%c8_96] : memref<48xf32, #tpu.memory_space<smem>>
    %420 = vector.broadcast %419 : f32 to vector<8x128xf32>
    %421 = arith.mulf %420, %418 : vector<8x128xf32>
    %422 = arith.addf %402, %421 : vector<8x128xf32>
    %c20_97 = arith.constant 20 : index
    %423 = memref.load %arg5[%c20_97] : memref<48xf32, #tpu.memory_space<smem>>
    %424 = vector.broadcast %423 : f32 to vector<8x128xf32>
    %425 = arith.mulf %424, %418 : vector<8x128xf32>
    %426 = arith.addf %406, %425 : vector<8x128xf32>
    %c32_98 = arith.constant 32 : index
    %427 = memref.load %arg5[%c32_98] : memref<48xf32, #tpu.memory_space<smem>>
    %428 = vector.broadcast %427 : f32 to vector<8x128xf32>
    %429 = arith.mulf %428, %418 : vector<8x128xf32>
    %430 = arith.addf %410, %429 : vector<8x128xf32>
    %c44_99 = arith.constant 44 : index
    %431 = memref.load %arg5[%c44_99] : memref<48xf32, #tpu.memory_space<smem>>
    %432 = vector.broadcast %431 : f32 to vector<8x128xf32>
    %433 = arith.mulf %432, %418 : vector<8x128xf32>
    %434 = arith.addf %414, %433 : vector<8x128xf32>
    %c0_100 = arith.constant 0 : index
    %c3_101 = arith.constant 3 : index
    %c0_102 = arith.constant 0 : index
    %c0_103 = arith.constant 0 : index
    %435 = vector.load %arg9[%c0_100, %c3_101, %c0_102, %c0_103] : memref<1x4x8x128xf32, #tpu.memory_space<vmem>>, vector<1x1x8x128xf32>
    %436 = vector.shape_cast %435 : vector<1x1x8x128xf32> to vector<8x128xf32>
    %c8_i32_104 = arith.constant 8 : i32
    %437 = tpu.dynamic_rotate %436 by %c8_i32_104 dim 1 : vector<8x128xf32>, i32 -> vector<8x128xf32>
    %438 = vector.extract_strided_slice %0 {offsets = [3, 0], sizes = [1, 128], strides = [1, 1]} : vector<8x128xf32> to vector<1x128xf32>
    %439 = vector.broadcast %438 : vector<1x128xf32> to vector<8x128xf32>
    %440 = arith.mulf %437, %439 : vector<8x128xf32>
    %c9_105 = arith.constant 9 : index
    %441 = memref.load %arg5[%c9_105] : memref<48xf32, #tpu.memory_space<smem>>
    %442 = vector.broadcast %441 : f32 to vector<8x128xf32>
    %443 = arith.mulf %442, %440 : vector<8x128xf32>
    %444 = arith.addf %422, %443 : vector<8x128xf32>
    %c21_106 = arith.constant 21 : index
    %445 = memref.load %arg5[%c21_106] : memref<48xf32, #tpu.memory_space<smem>>
    %446 = vector.broadcast %445 : f32 to vector<8x128xf32>
    %447 = arith.mulf %446, %440 : vector<8x128xf32>
    %448 = arith.addf %426, %447 : vector<8x128xf32>
    %c33_107 = arith.constant 33 : index
    %449 = memref.load %arg5[%c33_107] : memref<48xf32, #tpu.memory_space<smem>>
    %450 = vector.broadcast %449 : f32 to vector<8x128xf32>
    %451 = arith.mulf %450, %440 : vector<8x128xf32>
    %452 = arith.addf %430, %451 : vector<8x128xf32>
    %c45_108 = arith.constant 45 : index
    %453 = memref.load %arg5[%c45_108] : memref<48xf32, #tpu.memory_space<smem>>
    %454 = vector.broadcast %453 : f32 to vector<8x128xf32>
    %455 = arith.mulf %454, %440 : vector<8x128xf32>
    %456 = arith.addf %434, %455 : vector<8x128xf32>
    %c10_109 = arith.constant 10 : index
    %457 = memref.load %arg5[%c10_109] : memref<48xf32, #tpu.memory_space<smem>>
    %458 = vector.broadcast %457 : f32 to vector<8x128xf32>
    %459 = arith.mulf %458, %436 : vector<8x128xf32>
    %460 = arith.addf %444, %459 : vector<8x128xf32>
    %c22_110 = arith.constant 22 : index
    %461 = memref.load %arg5[%c22_110] : memref<48xf32, #tpu.memory_space<smem>>
    %462 = vector.broadcast %461 : f32 to vector<8x128xf32>
    %463 = arith.mulf %462, %436 : vector<8x128xf32>
    %464 = arith.addf %448, %463 : vector<8x128xf32>
    %c34_111 = arith.constant 34 : index
    %465 = memref.load %arg5[%c34_111] : memref<48xf32, #tpu.memory_space<smem>>
    %466 = vector.broadcast %465 : f32 to vector<8x128xf32>
    %467 = arith.mulf %466, %436 : vector<8x128xf32>
    %468 = arith.addf %452, %467 : vector<8x128xf32>
    %c46_112 = arith.constant 46 : index
    %469 = memref.load %arg5[%c46_112] : memref<48xf32, #tpu.memory_space<smem>>
    %470 = vector.broadcast %469 : f32 to vector<8x128xf32>
    %471 = arith.mulf %470, %436 : vector<8x128xf32>
    %472 = arith.addf %456, %471 : vector<8x128xf32>
    %c120_i32_113 = arith.constant 120 : i32
    %473 = tpu.dynamic_rotate %436 by %c120_i32_113 dim 1 : vector<8x128xf32>, i32 -> vector<8x128xf32>
    %474 = vector.extract_strided_slice %0 {offsets = [5, 0], sizes = [1, 128], strides = [1, 1]} : vector<8x128xf32> to vector<1x128xf32>
    %475 = vector.broadcast %474 : vector<1x128xf32> to vector<8x128xf32>
    %476 = arith.mulf %473, %475 : vector<8x128xf32>
    %c11_114 = arith.constant 11 : index
    %477 = memref.load %arg5[%c11_114] : memref<48xf32, #tpu.memory_space<smem>>
    %478 = vector.broadcast %477 : f32 to vector<8x128xf32>
    %479 = arith.mulf %478, %476 : vector<8x128xf32>
    %480 = arith.addf %460, %479 : vector<8x128xf32>
    %c23_115 = arith.constant 23 : index
    %481 = memref.load %arg5[%c23_115] : memref<48xf32, #tpu.memory_space<smem>>
    %482 = vector.broadcast %481 : f32 to vector<8x128xf32>
    %483 = arith.mulf %482, %476 : vector<8x128xf32>
    %484 = arith.addf %464, %483 : vector<8x128xf32>
    %c35_116 = arith.constant 35 : index
    %485 = memref.load %arg5[%c35_116] : memref<48xf32, #tpu.memory_space<smem>>
    %486 = vector.broadcast %485 : f32 to vector<8x128xf32>
    %487 = arith.mulf %486, %476 : vector<8x128xf32>
    %488 = arith.addf %468, %487 : vector<8x128xf32>
    %c47_117 = arith.constant 47 : index
    %489 = memref.load %arg5[%c47_117] : memref<48xf32, #tpu.memory_space<smem>>
    %490 = vector.broadcast %489 : f32 to vector<8x128xf32>
    %491 = arith.mulf %490, %476 : vector<8x128xf32>
    %492 = arith.addf %472, %491 : vector<8x128xf32>
    %c0_118 = arith.constant 0 : index
    %c0_119 = arith.constant 0 : index
    %c0_120 = arith.constant 0 : index
    %493 = vector.load %arg10[%c0_118, %c0_119, %c0_120] : memref<4x8x128xf32, #tpu.memory_space<vmem>>, vector<1x8x128xf32>
    %494 = vector.shape_cast %493 : vector<1x8x128xf32> to vector<8x128xf32>
    %495 = vector.shape_cast %480 : vector<8x128xf32> to vector<1x8x128xf32>
    tpu.vector_store %arg10[%c0_118, %c0_119, %c0_120], %495 {strides = array<i32>} : memref<4x8x128xf32, #tpu.memory_space<vmem>>, vector<1x8x128xf32>,
    %c1_121 = arith.constant 1 : index
    %c0_122 = arith.constant 0 : index
    %c0_123 = arith.constant 0 : index
    %496 = vector.load %arg10[%c1_121, %c0_122, %c0_123] : memref<4x8x128xf32, #tpu.memory_space<vmem>>, vector<1x8x128xf32>
    %497 = vector.shape_cast %496 : vector<1x8x128xf32> to vector<8x128xf32>
    %498 = vector.shape_cast %484 : vector<8x128xf32> to vector<1x8x128xf32>
    tpu.vector_store %arg10[%c1_121, %c0_122, %c0_123], %498 {strides = array<i32>} : memref<4x8x128xf32, #tpu.memory_space<vmem>>, vector<1x8x128xf32>,
    %c2_124 = arith.constant 2 : index
    %c0_125 = arith.constant 0 : index
    %c0_126 = arith.constant 0 : index
    %499 = vector.load %arg10[%c2_124, %c0_125, %c0_126] : memref<4x8x128xf32, #tpu.memory_space<vmem>>, vector<1x8x128xf32>
    %500 = vector.shape_cast %499 : vector<1x8x128xf32> to vector<8x128xf32>
    %501 = vector.shape_cast %488 : vector<8x128xf32> to vector<1x8x128xf32>
    tpu.vector_store %arg10[%c2_124, %c0_125, %c0_126], %501 {strides = array<i32>} : memref<4x8x128xf32, #tpu.memory_space<vmem>>, vector<1x8x128xf32>,
    %c3_127 = arith.constant 3 : index
    %c0_128 = arith.constant 0 : index
    %c0_129 = arith.constant 0 : index
    %502 = vector.load %arg10[%c3_127, %c0_128, %c0_129] : memref<4x8x128xf32, #tpu.memory_space<vmem>>, vector<1x8x128xf32>
    %503 = vector.shape_cast %502 : vector<1x8x128xf32> to vector<8x128xf32>
    %504 = vector.shape_cast %492 : vector<8x128xf32> to vector<1x8x128xf32>
    tpu.vector_store %arg10[%c3_127, %c0_128, %c0_129], %504 {strides = array<i32>} : memref<4x8x128xf32, #tpu.memory_space<vmem>>, vector<1x8x128xf32>,
    %505 = tpu.iota {dimensions = array<i32: 0>} : vector<8x128xi32>
    %c-1_i32 = arith.constant -1 : i32
    %506 = vector.broadcast %c-1_i32 : i32 to vector<8x128xi32>
    %507 = arith.addi %505, %506 : vector<8x128xi32>
    %c0_i32 = arith.constant 0 : i32
    %508 = vector.broadcast %c0_i32 : i32 to vector<8x128xi32>
    %509 = arith.cmpi sge, %507, %508 : vector<8x128xi32>
    %c-1_i32_130 = arith.constant -1 : i32
    %510 = vector.broadcast %c-1_i32_130 : i32 to vector<8x128xi32>
    %511 = arith.addi %505, %510 : vector<8x128xi32>
    %c8_i32_131 = arith.constant 8 : i32
    %512 = vector.broadcast %c8_i32_131 : i32 to vector<8x128xi32>
    %513 = arith.cmpi slt, %511, %512 : vector<8x128xi32>
    %514 = arith.andi %509, %513 : vector<8x128xi1>
    %515 = arith.extui %514 : vector<8x128xi1> to vector<8x128xi32>
    %516 = arith.sitofp %515 : vector<8x128xi32> to vector<8x128xf32>
    %c1_i32_132 = arith.constant 1 : i32
    %517 = vector.broadcast %c1_i32_132 : i32 to vector<8x128xi32>
    %518 = arith.addi %505, %517 : vector<8x128xi32>
    %c0_i32_133 = arith.constant 0 : i32
    %519 = vector.broadcast %c0_i32_133 : i32 to vector<8x128xi32>
    %520 = arith.cmpi sge, %518, %519 : vector<8x128xi32>
    %c1_i32_134 = arith.constant 1 : i32
    %521 = vector.broadcast %c1_i32_134 : i32 to vector<8x128xi32>
    %522 = arith.addi %505, %521 : vector<8x128xi32>
    %c8_i32_135 = arith.constant 8 : i32
    %523 = vector.broadcast %c8_i32_135 : i32 to vector<8x128xi32>
    %524 = arith.cmpi slt, %522, %523 : vector<8x128xi32>
    %525 = arith.andi %520, %524 : vector<8x128xi1>
    %526 = arith.extui %525 : vector<8x128xi1> to vector<8x128xi32>
    %527 = arith.sitofp %526 : vector<8x128xi32> to vector<8x128xf32>
    %c0_136 = arith.constant 0 : index
    %528 = memref.load %arg8[%c0_136] : memref<4xf32, #tpu.memory_space<smem>>
    %529 = vector.broadcast %528 : f32 to vector<8x128xf32>
    %c1_137 = arith.constant 1 : index
    %530 = memref.load %arg8[%c1_137] : memref<4xf32, #tpu.memory_space<smem>>
    %531 = vector.broadcast %530 : f32 to vector<8x128xf32>
    %c2_138 = arith.constant 2 : index
    %532 = memref.load %arg8[%c2_138] : memref<4xf32, #tpu.memory_space<smem>>
    %533 = vector.broadcast %532 : f32 to vector<8x128xf32>
    %c3_139 = arith.constant 3 : index
    %534 = memref.load %arg8[%c3_139] : memref<4xf32, #tpu.memory_space<smem>>
    %535 = vector.broadcast %534 : f32 to vector<8x128xf32>
    %c0_140 = arith.constant 0 : index
    %c0_141 = arith.constant 0 : index
    %c0_142 = arith.constant 0 : index
    %536 = vector.load %arg10[%c0_140, %c0_141, %c0_142] : memref<4x8x128xf32, #tpu.memory_space<vmem>>, vector<1x8x128xf32>
    %537 = vector.shape_cast %536 : vector<1x8x128xf32> to vector<8x128xf32>
    %c1_i32_143 = arith.constant 1 : i32
    %538 = tpu.dynamic_rotate %537 by %c1_i32_143 dim 0 : vector<8x128xf32>, i32 -> vector<8x128xf32>
    %539 = arith.mulf %538, %516 : vector<8x128xf32>
    %c0_144 = arith.constant 0 : index
    %540 = memref.load %arg7[%c0_144] : memref<48xf32, #tpu.memory_space<smem>>
    %541 = vector.broadcast %540 : f32 to vector<8x128xf32>
    %542 = arith.mulf %541, %539 : vector<8x128xf32>
    %543 = arith.addf %529, %542 : vector<8x128xf32>
    %c12_145 = arith.constant 12 : index
    %544 = memref.load %arg7[%c12_145] : memref<48xf32, #tpu.memory_space<smem>>
    %545 = vector.broadcast %544 : f32 to vector<8x128xf32>
    %546 = arith.mulf %545, %539 : vector<8x128xf32>
    %547 = arith.addf %531, %546 : vector<8x128xf32>
    %c24_146 = arith.constant 24 : index
    %548 = memref.load %arg7[%c24_146] : memref<48xf32, #tpu.memory_space<smem>>
    %549 = vector.broadcast %548 : f32 to vector<8x128xf32>
    %550 = arith.mulf %549, %539 : vector<8x128xf32>
    %551 = arith.addf %533, %550 : vector<8x128xf32>
    %c36_147 = arith.constant 36 : index
    %552 = memref.load %arg7[%c36_147] : memref<48xf32, #tpu.memory_space<smem>>
    %553 = vector.broadcast %552 : f32 to vector<8x128xf32>
    %554 = arith.mulf %553, %539 : vector<8x128xf32>
    %555 = arith.addf %535, %554 : vector<8x128xf32>
    %c1_148 = arith.constant 1 : index
    %556 = memref.load %arg7[%c1_148] : memref<48xf32, #tpu.memory_space<smem>>
    %557 = vector.broadcast %556 : f32 to vector<8x128xf32>
    %558 = arith.mulf %557, %537 : vector<8x128xf32>
    %559 = arith.addf %543, %558 : vector<8x128xf32>
    %c13_149 = arith.constant 13 : index
    %560 = memref.load %arg7[%c13_149] : memref<48xf32, #tpu.memory_space<smem>>
    %561 = vector.broadcast %560 : f32 to vector<8x128xf32>
    %562 = arith.mulf %561, %537 : vector<8x128xf32>
    %563 = arith.addf %547, %562 : vector<8x128xf32>
    %c25_150 = arith.constant 25 : index
    %564 = memref.load %arg7[%c25_150] : memref<48xf32, #tpu.memory_space<smem>>
    %565 = vector.broadcast %564 : f32 to vector<8x128xf32>
    %566 = arith.mulf %565, %537 : vector<8x128xf32>
    %567 = arith.addf %551, %566 : vector<8x128xf32>
    %c37_151 = arith.constant 37 : index
    %568 = memref.load %arg7[%c37_151] : memref<48xf32, #tpu.memory_space<smem>>
    %569 = vector.broadcast %568 : f32 to vector<8x128xf32>
    %570 = arith.mulf %569, %537 : vector<8x128xf32>
    %571 = arith.addf %555, %570 : vector<8x128xf32>
    %c7_i32 = arith.constant 7 : i32
    %572 = tpu.dynamic_rotate %537 by %c7_i32 dim 0 : vector<8x128xf32>, i32 -> vector<8x128xf32>
    %573 = arith.mulf %572, %527 : vector<8x128xf32>
    %c2_152 = arith.constant 2 : index
    %574 = memref.load %arg7[%c2_152] : memref<48xf32, #tpu.memory_space<smem>>
    %575 = vector.broadcast %574 : f32 to vector<8x128xf32>
    %576 = arith.mulf %575, %573 : vector<8x128xf32>
    %577 = arith.addf %559, %576 : vector<8x128xf32>
    %c14_153 = arith.constant 14 : index
    %578 = memref.load %arg7[%c14_153] : memref<48xf32, #tpu.memory_space<smem>>
    %579 = vector.broadcast %578 : f32 to vector<8x128xf32>
    %580 = arith.mulf %579, %573 : vector<8x128xf32>
    %581 = arith.addf %563, %580 : vector<8x128xf32>
    %c26_154 = arith.constant 26 : index
    %582 = memref.load %arg7[%c26_154] : memref<48xf32, #tpu.memory_space<smem>>
    %583 = vector.broadcast %582 : f32 to vector<8x128xf32>
    %584 = arith.mulf %583, %573 : vector<8x128xf32>
    %585 = arith.addf %567, %584 : vector<8x128xf32>
    %c38_155 = arith.constant 38 : index
    %586 = memref.load %arg7[%c38_155] : memref<48xf32, #tpu.memory_space<smem>>
    %587 = vector.broadcast %586 : f32 to vector<8x128xf32>
    %588 = arith.mulf %587, %573 : vector<8x128xf32>
    %589 = arith.addf %571, %588 : vector<8x128xf32>
    %c1_156 = arith.constant 1 : index
    %c0_157 = arith.constant 0 : index
    %c0_158 = arith.constant 0 : index
    %590 = vector.load %arg10[%c1_156, %c0_157, %c0_158] : memref<4x8x128xf32, #tpu.memory_space<vmem>>, vector<1x8x128xf32>
    %591 = vector.shape_cast %590 : vector<1x8x128xf32> to vector<8x128xf32>
    %c1_i32_159 = arith.constant 1 : i32
    %592 = tpu.dynamic_rotate %591 by %c1_i32_159 dim 0 : vector<8x128xf32>, i32 -> vector<8x128xf32>
    %593 = arith.mulf %592, %516 : vector<8x128xf32>
    %c3_160 = arith.constant 3 : index
    %594 = memref.load %arg7[%c3_160] : memref<48xf32, #tpu.memory_space<smem>>
    %595 = vector.broadcast %594 : f32 to vector<8x128xf32>
    %596 = arith.mulf %595, %593 : vector<8x128xf32>
    %597 = arith.addf %577, %596 : vector<8x128xf32>
    %c15_161 = arith.constant 15 : index
    %598 = memref.load %arg7[%c15_161] : memref<48xf32, #tpu.memory_space<smem>>
    %599 = vector.broadcast %598 : f32 to vector<8x128xf32>
    %600 = arith.mulf %599, %593 : vector<8x128xf32>
    %601 = arith.addf %581, %600 : vector<8x128xf32>
    %c27_162 = arith.constant 27 : index
    %602 = memref.load %arg7[%c27_162] : memref<48xf32, #tpu.memory_space<smem>>
    %603 = vector.broadcast %602 : f32 to vector<8x128xf32>
    %604 = arith.mulf %603, %593 : vector<8x128xf32>
    %605 = arith.addf %585, %604 : vector<8x128xf32>
    %c39_163 = arith.constant 39 : index
    %606 = memref.load %arg7[%c39_163] : memref<48xf32, #tpu.memory_space<smem>>
    %607 = vector.broadcast %606 : f32 to vector<8x128xf32>
    %608 = arith.mulf %607, %593 : vector<8x128xf32>
    %609 = arith.addf %589, %608 : vector<8x128xf32>
    %c4_164 = arith.constant 4 : index
    %610 = memref.load %arg7[%c4_164] : memref<48xf32, #tpu.memory_space<smem>>
    %611 = vector.broadcast %610 : f32 to vector<8x128xf32>
    %612 = arith.mulf %611, %591 : vector<8x128xf32>
    %613 = arith.addf %597, %612 : vector<8x128xf32>
    %c16_165 = arith.constant 16 : index
    %614 = memref.load %arg7[%c16_165] : memref<48xf32, #tpu.memory_space<smem>>
    %615 = vector.broadcast %614 : f32 to vector<8x128xf32>
    %616 = arith.mulf %615, %591 : vector<8x128xf32>
    %617 = arith.addf %601, %616 : vector<8x128xf32>
    %c28_166 = arith.constant 28 : index
    %618 = memref.load %arg7[%c28_166] : memref<48xf32, #tpu.memory_space<smem>>
    %619 = vector.broadcast %618 : f32 to vector<8x128xf32>
    %620 = arith.mulf %619, %591 : vector<8x128xf32>
    %621 = arith.addf %605, %620 : vector<8x128xf32>
    %c40_167 = arith.constant 40 : index
    %622 = memref.load %arg7[%c40_167] : memref<48xf32, #tpu.memory_space<smem>>
    %623 = vector.broadcast %622 : f32 to vector<8x128xf32>
    %624 = arith.mulf %623, %591 : vector<8x128xf32>
    %625 = arith.addf %609, %624 : vector<8x128xf32>
    %c7_i32_168 = arith.constant 7 : i32
    %626 = tpu.dynamic_rotate %591 by %c7_i32_168 dim 0 : vector<8x128xf32>, i32 -> vector<8x128xf32>
    %627 = arith.mulf %626, %527 : vector<8x128xf32>
    %c5_169 = arith.constant 5 : index
    %628 = memref.load %arg7[%c5_169] : memref<48xf32, #tpu.memory_space<smem>>
    %629 = vector.broadcast %628 : f32 to vector<8x128xf32>
    %630 = arith.mulf %629, %627 : vector<8x128xf32>
    %631 = arith.addf %613, %630 : vector<8x128xf32>
    %c17_170 = arith.constant 17 : index
    %632 = memref.load %arg7[%c17_170] : memref<48xf32, #tpu.memory_space<smem>>
    %633 = vector.broadcast %632 : f32 to vector<8x128xf32>
    %634 = arith.mulf %633, %627 : vector<8x128xf32>
    %635 = arith.addf %617, %634 : vector<8x128xf32>
    %c29_171 = arith.constant 29 : index
    %636 = memref.load %arg7[%c29_171] : memref<48xf32, #tpu.memory_space<smem>>
    %637 = vector.broadcast %636 : f32 to vector<8x128xf32>
    %638 = arith.mulf %637, %627 : vector<8x128xf32>
    %639 = arith.addf %621, %638 : vector<8x128xf32>
    %c41_172 = arith.constant 41 : index
    %640 = memref.load %arg7[%c41_172] : memref<48xf32, #tpu.memory_space<smem>>
    %641 = vector.broadcast %640 : f32 to vector<8x128xf32>
    %642 = arith.mulf %641, %627 : vector<8x128xf32>
    %643 = arith.addf %625, %642 : vector<8x128xf32>
    %c2_173 = arith.constant 2 : index
    %c0_174 = arith.constant 0 : index
    %c0_175 = arith.constant 0 : index
    %644 = vector.load %arg10[%c2_173, %c0_174, %c0_175] : memref<4x8x128xf32, #tpu.memory_space<vmem>>, vector<1x8x128xf32>
    %645 = vector.shape_cast %644 : vector<1x8x128xf32> to vector<8x128xf32>
    %c1_i32_176 = arith.constant 1 : i32
    %646 = tpu.dynamic_rotate %645 by %c1_i32_176 dim 0 : vector<8x128xf32>, i32 -> vector<8x128xf32>
    %647 = arith.mulf %646, %516 : vector<8x128xf32>
    %c6_177 = arith.constant 6 : index
    %648 = memref.load %arg7[%c6_177] : memref<48xf32, #tpu.memory_space<smem>>
    %649 = vector.broadcast %648 : f32 to vector<8x128xf32>
    %650 = arith.mulf %649, %647 : vector<8x128xf32>
    %651 = arith.addf %631, %650 : vector<8x128xf32>
    %c18_178 = arith.constant 18 : index
    %652 = memref.load %arg7[%c18_178] : memref<48xf32, #tpu.memory_space<smem>>
    %653 = vector.broadcast %652 : f32 to vector<8x128xf32>
    %654 = arith.mulf %653, %647 : vector<8x128xf32>
    %655 = arith.addf %635, %654 : vector<8x128xf32>
    %c30_179 = arith.constant 30 : index
    %656 = memref.load %arg7[%c30_179] : memref<48xf32, #tpu.memory_space<smem>>
    %657 = vector.broadcast %656 : f32 to vector<8x128xf32>
    %658 = arith.mulf %657, %647 : vector<8x128xf32>
    %659 = arith.addf %639, %658 : vector<8x128xf32>
    %c42_180 = arith.constant 42 : index
    %660 = memref.load %arg7[%c42_180] : memref<48xf32, #tpu.memory_space<smem>>
    %661 = vector.broadcast %660 : f32 to vector<8x128xf32>
    %662 = arith.mulf %661, %647 : vector<8x128xf32>
    %663 = arith.addf %643, %662 : vector<8x128xf32>
    %c7_181 = arith.constant 7 : index
    %664 = memref.load %arg7[%c7_181] : memref<48xf32, #tpu.memory_space<smem>>
    %665 = vector.broadcast %664 : f32 to vector<8x128xf32>
    %666 = arith.mulf %665, %645 : vector<8x128xf32>
    %667 = arith.addf %651, %666 : vector<8x128xf32>
    %c19_182 = arith.constant 19 : index
    %668 = memref.load %arg7[%c19_182] : memref<48xf32, #tpu.memory_space<smem>>
    %669 = vector.broadcast %668 : f32 to vector<8x128xf32>
    %670 = arith.mulf %669, %645 : vector<8x128xf32>
    %671 = arith.addf %655, %670 : vector<8x128xf32>
    %c31_183 = arith.constant 31 : index
    %672 = memref.load %arg7[%c31_183] : memref<48xf32, #tpu.memory_space<smem>>
    %673 = vector.broadcast %672 : f32 to vector<8x128xf32>
    %674 = arith.mulf %673, %645 : vector<8x128xf32>
    %675 = arith.addf %659, %674 : vector<8x128xf32>
    %c43_184 = arith.constant 43 : index
    %676 = memref.load %arg7[%c43_184] : memref<48xf32, #tpu.memory_space<smem>>
    %677 = vector.broadcast %676 : f32 to vector<8x128xf32>
    %678 = arith.mulf %677, %645 : vector<8x128xf32>
    %679 = arith.addf %663, %678 : vector<8x128xf32>
    %c7_i32_185 = arith.constant 7 : i32
    %680 = tpu.dynamic_rotate %645 by %c7_i32_185 dim 0 : vector<8x128xf32>, i32 -> vector<8x128xf32>
    %681 = arith.mulf %680, %527 : vector<8x128xf32>
    %c8_186 = arith.constant 8 : index
    %682 = memref.load %arg7[%c8_186] : memref<48xf32, #tpu.memory_space<smem>>
    %683 = vector.broadcast %682 : f32 to vector<8x128xf32>
    %684 = arith.mulf %683, %681 : vector<8x128xf32>
    %685 = arith.addf %667, %684 : vector<8x128xf32>
    %c20_187 = arith.constant 20 : index
    %686 = memref.load %arg7[%c20_187] : memref<48xf32, #tpu.memory_space<smem>>
    %687 = vector.broadcast %686 : f32 to vector<8x128xf32>
    %688 = arith.mulf %687, %681 : vector<8x128xf32>
    %689 = arith.addf %671, %688 : vector<8x128xf32>
    %c32_188 = arith.constant 32 : index
    %690 = memref.load %arg7[%c32_188] : memref<48xf32, #tpu.memory_space<smem>>
    %691 = vector.broadcast %690 : f32 to vector<8x128xf32>
    %692 = arith.mulf %691, %681 : vector<8x128xf32>
    %693 = arith.addf %675, %692 : vector<8x128xf32>
    %c44_189 = arith.constant 44 : index
    %694 = memref.load %arg7[%c44_189] : memref<48xf32, #tpu.memory_space<smem>>
    %695 = vector.broadcast %694 : f32 to vector<8x128xf32>
    %696 = arith.mulf %695, %681 : vector<8x128xf32>
    %697 = arith.addf %679, %696 : vector<8x128xf32>
    %c3_190 = arith.constant 3 : index
    %c0_191 = arith.constant 0 : index
    %c0_192 = arith.constant 0 : index
    %698 = vector.load %arg10[%c3_190, %c0_191, %c0_192] : memref<4x8x128xf32, #tpu.memory_space<vmem>>, vector<1x8x128xf32>
    %699 = vector.shape_cast %698 : vector<1x8x128xf32> to vector<8x128xf32>
    %c1_i32_193 = arith.constant 1 : i32
    %700 = tpu.dynamic_rotate %699 by %c1_i32_193 dim 0 : vector<8x128xf32>, i32 -> vector<8x128xf32>
    %701 = arith.mulf %700, %516 : vector<8x128xf32>
    %c9_194 = arith.constant 9 : index
    %702 = memref.load %arg7[%c9_194] : memref<48xf32, #tpu.memory_space<smem>>
    %703 = vector.broadcast %702 : f32 to vector<8x128xf32>
    %704 = arith.mulf %703, %701 : vector<8x128xf32>
    %705 = arith.addf %685, %704 : vector<8x128xf32>
    %c21_195 = arith.constant 21 : index
    %706 = memref.load %arg7[%c21_195] : memref<48xf32, #tpu.memory_space<smem>>
    %707 = vector.broadcast %706 : f32 to vector<8x128xf32>
    %708 = arith.mulf %707, %701 : vector<8x128xf32>
    %709 = arith.addf %689, %708 : vector<8x128xf32>
    %c33_196 = arith.constant 33 : index
    %710 = memref.load %arg7[%c33_196] : memref<48xf32, #tpu.memory_space<smem>>
    %711 = vector.broadcast %710 : f32 to vector<8x128xf32>
    %712 = arith.mulf %711, %701 : vector<8x128xf32>
    %713 = arith.addf %693, %712 : vector<8x128xf32>
    %c45_197 = arith.constant 45 : index
    %714 = memref.load %arg7[%c45_197] : memref<48xf32, #tpu.memory_space<smem>>
    %715 = vector.broadcast %714 : f32 to vector<8x128xf32>
    %716 = arith.mulf %715, %701 : vector<8x128xf32>
    %717 = arith.addf %697, %716 : vector<8x128xf32>
    %c10_198 = arith.constant 10 : index
    %718 = memref.load %arg7[%c10_198] : memref<48xf32, #tpu.memory_space<smem>>
    %719 = vector.broadcast %718 : f32 to vector<8x128xf32>
    %720 = arith.mulf %719, %699 : vector<8x128xf32>
    %721 = arith.addf %705, %720 : vector<8x128xf32>
    %c22_199 = arith.constant 22 : index
    %722 = memref.load %arg7[%c22_199] : memref<48xf32, #tpu.memory_space<smem>>
    %723 = vector.broadcast %722 : f32 to vector<8x128xf32>
    %724 = arith.mulf %723, %699 : vector<8x128xf32>
    %725 = arith.addf %709, %724 : vector<8x128xf32>
    %c34_200 = arith.constant 34 : index
    %726 = memref.load %arg7[%c34_200] : memref<48xf32, #tpu.memory_space<smem>>
    %727 = vector.broadcast %726 : f32 to vector<8x128xf32>
    %728 = arith.mulf %727, %699 : vector<8x128xf32>
    %729 = arith.addf %713, %728 : vector<8x128xf32>
    %c46_201 = arith.constant 46 : index
    %730 = memref.load %arg7[%c46_201] : memref<48xf32, #tpu.memory_space<smem>>
    %731 = vector.broadcast %730 : f32 to vector<8x128xf32>
    %732 = arith.mulf %731, %699 : vector<8x128xf32>
    %733 = arith.addf %717, %732 : vector<8x128xf32>
    %c7_i32_202 = arith.constant 7 : i32
    %734 = tpu.dynamic_rotate %699 by %c7_i32_202 dim 0 : vector<8x128xf32>, i32 -> vector<8x128xf32>
    %735 = arith.mulf %734, %527 : vector<8x128xf32>
    %c11_203 = arith.constant 11 : index
    %736 = memref.load %arg7[%c11_203] : memref<48xf32, #tpu.memory_space<smem>>
    %737 = vector.broadcast %736 : f32 to vector<8x128xf32>
    %738 = arith.mulf %737, %735 : vector<8x128xf32>
    %739 = arith.addf %721, %738 : vector<8x128xf32>
    %c23_204 = arith.constant 23 : index
    %740 = memref.load %arg7[%c23_204] : memref<48xf32, #tpu.memory_space<smem>>
    %741 = vector.broadcast %740 : f32 to vector<8x128xf32>
    %742 = arith.mulf %741, %735 : vector<8x128xf32>
    %743 = arith.addf %725, %742 : vector<8x128xf32>
    %c35_205 = arith.constant 35 : index
    %744 = memref.load %arg7[%c35_205] : memref<48xf32, #tpu.memory_space<smem>>
    %745 = vector.broadcast %744 : f32 to vector<8x128xf32>
    %746 = arith.mulf %745, %735 : vector<8x128xf32>
    %747 = arith.addf %729, %746 : vector<8x128xf32>
    %c47_206 = arith.constant 47 : index
    %748 = memref.load %arg7[%c47_206] : memref<48xf32, #tpu.memory_space<smem>>
    %749 = vector.broadcast %748 : f32 to vector<8x128xf32>
    %750 = arith.mulf %749, %735 : vector<8x128xf32>
    %751 = arith.addf %733, %750 : vector<8x128xf32>
    %c0_207 = arith.constant 0 : index
    %c0_208 = arith.constant 0 : index
    %c0_209 = arith.constant 0 : index
    %c0_210 = arith.constant 0 : index
    %752 = vector.load %arg9[%c0_207, %c0_208, %c0_209, %c0_210] : memref<1x4x8x128xf32, #tpu.memory_space<vmem>>, vector<1x1x8x128xf32>
    %753 = vector.shape_cast %752 : vector<1x1x8x128xf32> to vector<8x128xf32>
    %754 = vector.shape_cast %739 : vector<8x128xf32> to vector<1x1x8x128xf32>
    tpu.vector_store %arg9[%c0_207, %c0_208, %c0_209, %c0_210], %754 {strides = array<i32>} : memref<1x4x8x128xf32, #tpu.memory_space<vmem>>, vector<1x1x8x128xf32>,
    %c0_211 = arith.constant 0 : index
    %c1_212 = arith.constant 1 : index
    %c0_213 = arith.constant 0 : index
    %c0_214 = arith.constant 0 : index
    %755 = vector.load %arg9[%c0_211, %c1_212, %c0_213, %c0_214] : memref<1x4x8x128xf32, #tpu.memory_space<vmem>>, vector<1x1x8x128xf32>
    %756 = vector.shape_cast %755 : vector<1x1x8x128xf32> to vector<8x128xf32>
    %757 = vector.shape_cast %743 : vector<8x128xf32> to vector<1x1x8x128xf32>
    tpu.vector_store %arg9[%c0_211, %c1_212, %c0_213, %c0_214], %757 {strides = array<i32>} : memref<1x4x8x128xf32, #tpu.memory_space<vmem>>, vector<1x1x8x128xf32>,
    %c0_215 = arith.constant 0 : index
    %c2_216 = arith.constant 2 : index
    %c0_217 = arith.constant 0 : index
    %c0_218 = arith.constant 0 : index
    %758 = vector.load %arg9[%c0_215, %c2_216, %c0_217, %c0_218] : memref<1x4x8x128xf32, #tpu.memory_space<vmem>>, vector<1x1x8x128xf32>
    %759 = vector.shape_cast %758 : vector<1x1x8x128xf32> to vector<8x128xf32>
    %760 = vector.shape_cast %747 : vector<8x128xf32> to vector<1x1x8x128xf32>
    tpu.vector_store %arg9[%c0_215, %c2_216, %c0_217, %c0_218], %760 {strides = array<i32>} : memref<1x4x8x128xf32, #tpu.memory_space<vmem>>, vector<1x1x8x128xf32>,
    %c0_219 = arith.constant 0 : index
    %c3_220 = arith.constant 3 : index
    %c0_221 = arith.constant 0 : index
    %c0_222 = arith.constant 0 : index
    %761 = vector.load %arg9[%c0_219, %c3_220, %c0_221, %c0_222] : memref<1x4x8x128xf32, #tpu.memory_space<vmem>>, vector<1x1x8x128xf32>
    %762 = vector.shape_cast %761 : vector<1x1x8x128xf32> to vector<8x128xf32>
    %763 = vector.shape_cast %751 : vector<8x128xf32> to vector<1x1x8x128xf32>
    tpu.vector_store %arg9[%c0_219, %c3_220, %c0_221, %c0_222], %763 {strides = array<i32>} : memref<1x4x8x128xf32, #tpu.memory_space<vmem>>, vector<1x1x8x128xf32>,
    return
  }
  func.func @transform_0(%arg0: i32) -> (i32, i32, i32, i32) {
    %c0_i32 = arith.constant 0 : i32
    %c0_i32_0 = arith.constant 0 : i32
    %c0_i32_1 = arith.constant 0 : i32
    %c0_i32_2 = arith.constant 0 : i32
    return %arg0, %c0_i32, %c0_i32_0, %c0_i32_1 : i32, i32, i32, i32
  }
  func.func @transform_1(%arg0: i32) -> (i32, i32) {
    %c0_i32 = arith.constant 0 : i32
    %c0_i32_0 = arith.constant 0 : i32
    %c0_i32_1 = arith.constant 0 : i32
    return %c0_i32, %c0_i32_0 : i32, i32
  }
  func.func @transform_2(%arg0: i32) -> i32 {
    %c0_i32 = arith.constant 0 : i32
    %c0_i32_0 = arith.constant 0 : i32
    return %c0_i32 : i32
  }
  func.func @transform_3(%arg0: i32) -> i32 {
    %c0_i32 = arith.constant 0 : i32
    %c0_i32_0 = arith.constant 0 : i32
    return %c0_i32 : i32
  }
  func.func @transform_4(%arg0: i32) -> i32 {
    %c0_i32 = arith.constant 0 : i32
    %c0_i32_0 = arith.constant 0 : i32
    return %c0_i32 : i32
  }
  func.func @transform_5(%arg0: i32) -> i32 {
    %c0_i32 = arith.constant 0 : i32
    %c0_i32_0 = arith.constant 0 : i32
    return %c0_i32 : i32
  }
  func.func @transform_6(%arg0: i32) -> i32 {
    %c0_i32 = arith.constant 0 : i32
    %c0_i32_0 = arith.constant 0 : i32
    return %c0_i32 : i32
  }
  func.func @transform_7(%arg0: i32) -> i32 {
    %c0_i32 = arith.constant 0 : i32
    %c0_i32_0 = arith.constant 0 : i32
    return %c0_i32 : i32
  }
  func.func @transform_8(%arg0: i32) -> (i32, i32, i32, i32) {
    %c0_i32 = arith.constant 0 : i32
    %c0_i32_0 = arith.constant 0 : i32
    %c0_i32_1 = arith.constant 0 : i32
    %c0_i32_2 = arith.constant 0 : i32
    return %arg0, %c0_i32, %c0_i32_0, %c0_i32_1 : i32, i32, i32, i32
  }
}

</mosaic_0001>

<bundles_post_ra>
// kernel: tpu_custom_call.1
= control target key start
LH: loop header
LB: loop body
LE: loop exit
PB: predicated region body
PF: predicated region fallthrough
CT: control target
= control target key end

     0   :  { %s3122_s0 = inlined_call_operand.hbm [shape: f32[2,4,8,128], index: 0, kind: input, shape index: {}]   ;;  %s3123_s1 = inlined_call_operand.hbm [shape: f32[8,128], index: 1, kind: input, shape index: {}]   ;;  %s3124_s2 = inlined_call_operand.vmem [shape: f32[48], index: 2, kind: input, shape index: {}]   ;;  %s3125_s3 = inlined_call_operand.vmem [shape: f32[4], index: 3, kind: input, shape index: {}]   ;;  %s3126_s4 = inlined_call_operand.vmem [shape: f32[48], index: 4, kind: input, shape index: {}]   ;;  %s3127_s5 = inlined_call_operand.vmem [shape: f32[4], index: 5, kind: input, shape index: {}]   ;;  %s3128_s6 = inlined_call_operand.vmem [shape: f32[48], index: 6, kind: input, shape index: {}]   ;;  %s3129_s7 = inlined_call_operand.vmem [shape: f32[4], index: 7, kind: input, shape index: {}]   ;;  %s3130_s8 = inlined_call_operand.hbm [shape: f32[2,4,8,128], index: 8, kind: output, shape index: {}]  }
   0x1   :  { %3224 = sst [smem:[#allocation97_spill]] %s3122_s0 }
   0x2   :  { %3225 = sst [smem:[#allocation98_spill]] %s3123_s1 }
   0x3   :  { %3226 = sst [smem:[#allocation99_spill]] %s3124_s2 }
   0x4   :  { %3227 = sst [smem:[#allocation100_spill]] %s3125_s3 }
   0x5   :  { %3228 = sst [smem:[#allocation101_spill]] %s3126_s4 }
   0x6   :  { %3229 = sst [smem:[#allocation102_spill]] %s3127_s5 }
   0x7   :  { %3230 = sst [smem:[#allocation103_spill]] %s3128_s6 }
   0x8   :  { %3231 = sst [smem:[#allocation104_spill]] %s3129_s7 }
   0x9   :  { %3232 = sst [smem:[#allocation105_spill]] %s3130_s8 }
   0xa   :  { %13 = vsyncpa [#allocation4], 0 }
   0xb   :  { %15 = vsyncpa [#allocation4 + $0x1], 0 }
   0xc   :  { %16 = vsyncpa [#allocation8], 0 }
   0xd   :  { %17 = vsyncpa [#allocation6], 0 }
   0xe   :  { %18 = vsyncpa [#allocation11], 0 }
   0xf   :  { %19 = vsyncpa [#allocation14], 0 }
  0x10   :  { %20 = vsyncpa [#allocation17], 0 }
  0x11   :  { %21 = vsyncpa [#allocation5], 0 }
  0x12   :  { %23 = vsyncpa [#allocation5 + $0x1], 0  ;;  %s1916_s27 = smov 0   ;;  %s1918_s28 = smov 0  }
  0x13   :  { %s1920_s29 = smov 0   ;;  %s1922_s30 = smov 0  }
  0x14 LB: > { %3233 = sst [smem:[#allocation26_spill]] %s1840_s27  ;;  %s3237_s3 = sld [smem:[#allocation100_spill]]  ;;  %s1852_s30 = sphi %s1922_s30, %s3502_s30   ;;  %s1848_s29 = sphi %s1920_s29, %s3505_s29   ;;  %s1844_s28 = sphi %s1918_s28, %s3504_s28   ;;  %s1840_s27 = sphi %s1916_s27, %s3503_s27  }
  0x15   : > { %3234 = sst [smem:[#allocation27_spill]] %s1844_s28  ;;  %s1940_s12 = sadd.s32 4294967295, %s1852_s30  }
  0x16   : > { %3235 = sst [smem:[#allocation28_spill]] %s1848_s29  ;;  %p1300_p0 = scmp.ge.s32.totalorder %s1852_s30, 1 }
  0x17   : > { %3236 = sst [smem:[#allocation29_spill]] %s1852_s30  ;;  %p3131_p1 = scmp.eq.s32.totalorder %s1940_s12, 0 }
  0x18   : > { %3238 = sst [smem:[#allocation30_spill]] %s1940_s12  ;;  %p233_p2 = scmp.lt.s32.totalorder %s1852_s30, 3 }
  0x19   : > { %s3240_s5 = sld [smem:[#allocation102_spill]]  ;;  %s3241_s2 = sld [smem:[#allocation99_spill]] }
  0x1a   : > { %s268_s11 = sshll.u32 %s3237_s3, 4  ;;  %p1945_p3 = pnand %p1300_p0, %p233_p2  ;;  %s269_s11 = int_to_ptr.vmem [resolvable:$true] %s268_s11 }
  0x1b   : > { %s1854_s21 = smov [#allocation7]   ;;  %s1618_s23 = scalar_lea.vmem %s269_s11, 16 }
  0x1c   : > { %s3239_s13 = scalar_select %p1945_p3, 1, 0 }
  0x1d   : > { %p1525_p5 = pneg %p1945_p3  ;;  %s246_s22 = sshll.u32 %s1854_s21, 4  ;;  %s1966_s22 = int_to_ptr.vmem [resolvable:$true] %s246_s22 }
  0x1e   : > { %p1619_p7 = scmp.ne.s32.totalorder %s269_s11, %s1618_s23  ;;  %p1626_p11 = scmp.lt.s32.totalorder %s269_s11, %s269_s11 }
  0x1f   : > { %s290_s16 = sshll.u32 %s3240_s5, 4  ;;  %s257_s19 = sshll.u32 %s3241_s2, 4  ;;  %s1955_s16 = int_to_ptr.vmem [resolvable:$true] %s290_s16  ;;  %s1968_s19 = int_to_ptr.vmem [resolvable:$true] %s257_s19 }
  0x20   : > { %p1962_p6 = pnand %p1525_p5, %p3131_p1  ;;  %p1627_p12 = scmp.lt.s32.totalorder %s1618_s23, %s1618_s23 }
  0x22   : > { %p1972_p8 = pneg %p1962_p6  ;;  %p1628_p13 = por %p1627_p12, %p1626_p11 }
  0x24   : > { %p1621_p9 = pnand %p1972_p8, %p1619_p7 }
  0x26   : > { %p1622_p10 = pneg %p1621_p9 }
  0x28   : > { %p1629_p0 = pnand %p1628_p13, %p1622_p10 }
  0x2a   : > { %1632 = shalt.err (!%p1629_p0)
}
  0x2b   : > { %s1855_s25 = smov [#allocation10]   ;;  %s1633_s26 = scalar_lea.vmem %s1955_s16, 16 }
  0x2c   : > { %1534 = dma.vmem_to_smem (!%p1962_p6), %s269_s11, 16, %s1855_s25, [#allocation11]  }
  0x2d   : > { %p1634_p2 = scmp.ne.s32.totalorder %s1955_s16, %s1633_s26  ;;  %p1641_p7 = scmp.lt.s32.totalorder %s1955_s16, %s1955_s16 }
  0x2e   : > { %p1642_p9 = scmp.lt.s32.totalorder %s1633_s26, %s1633_s26 }
  0x2f   : > { %p1636_p5 = pnand %p1634_p2, %p1972_p8 }
  0x30   : > { %p1643_p1 = por %p1642_p9, %p1641_p7 }
  0x31   : > { %p1637_p4 = pneg %p1636_p5 }
  0x33   : > { %p1644_p11 = pnand %p1643_p1, %p1637_p4 }
  0x35   : > { %1647 = shalt.err (!%p1644_p11)
}
  0x36   : > { %s1856_s9 = smov [#allocation13]   ;;  %s3244_s1 = sld [smem:[#allocation98_spill]] }
  0x37   : > { %1540 = dma.vmem_to_smem (!%p1962_p6), %s1955_s16, 16, %s1856_s9, [#allocation14]  }
  0x3c   : > { %s1648_s11 = scalar_lea.hbm %s3244_s1, 128 }
  0x3d   : > { %p1649_p10 = scmp.ne.s32.totalorder %s3244_s1, %s1648_s11  ;;  %p1655_p1 = scmp.lt.u32.totalorder %s1648_s11, %s3244_s1 }
  0x3f   : > { %p1651_p12 = pnand %p1649_p10, %p1972_p8 }
  0x41   : > { %p1652_p13 = pneg %p1651_p12 }
  0x43   : > { %p1657_p4 = pnand %p1655_p1, %p1652_p13 }
  0x45   : > { %1660 = shalt.err (!%p1657_p4)
}
  0x46   : > { %s1661_s16 = scalar_lea.vmem %s1966_s22, 128  ;;  %p1669_p7 = scmp.lt.s32.totalorder %s1966_s22, %s1966_s22 }
  0x47   : > { %p1662_p0 = scmp.ne.s32.totalorder %s1966_s22, %s1661_s16  ;;  %p1670_p9 = scmp.lt.s32.totalorder %s1661_s16, %s1661_s16 }
  0x49   : > { %p1664_p2 = pnand %p1662_p0, %p1972_p8  ;;  %p1671_p11 = por %p1670_p9, %p1669_p7 }
  0x4b   : > { %p1665_p5 = pneg %p1664_p2 }
  0x4d   : > { %p1672_p10 = pnand %p1671_p11, %p1665_p5 }
  0x4f   : > { %1675 = shalt.err (!%p1672_p10)
}
  0x50   : > { %1528 = dma.hbm_to_vmem [thread:$0]  (!%p1962_p6), %s3244_s1, 128, %s1966_s22, [#allocation8]  }
  0x51   : > { %s1676_s26 = scalar_lea.vmem %s1968_s19, 16  ;;  %p1684_p4 = scmp.lt.s32.totalorder %s1968_s19, %s1968_s19 }
  0x52   : > { %p1677_p12 = scmp.ne.s32.totalorder %s1968_s19, %s1676_s26  ;;  %p1685_p0 = scmp.lt.s32.totalorder %s1676_s26, %s1676_s26 }
  0x54   : > { %p1679_p13 = pnand %p1677_p12, %p1972_p8  ;;  %p1686_p2 = por %p1685_p0, %p1684_p4 }
  0x56   : > { %p1680_p1 = pneg %p1679_p13 }
  0x58   : > { %p1687_p5 = pnand %p1686_p2, %p1680_p1 }
  0x5a   : > { %1690 = shalt.err (!%p1687_p5)
}
  0x5b   : > { %s1857_s9 = smov [#allocation9]   ;;  %s3245_s4 = sld [smem:[#allocation101_spill]] }
  0x5c   : > { %1531 = dma.vmem_to_smem (!%p1962_p6), %s1968_s19, 16, %s1857_s9, [#allocation6]  }
  0x5d   : > { %s3246_s6 = sld [smem:[#allocation103_spill]] }
  0x61   : > { %s279_s22 = sshll.u32 %s3245_s4, 4  ;;  %s280_s22 = int_to_ptr.vmem [resolvable:$true] %s279_s22 }
  0x62   : > { %s1691_s18 = scalar_lea.vmem %s280_s22, 16  ;;  %p1699_p10 = scmp.lt.s32.totalorder %s280_s22, %s280_s22 }
  0x63   : > { %s301_s17 = sshll.u32 %s3246_s6, 4  ;;  %p1692_p7 = scmp.ne.s32.totalorder %s280_s22, %s1691_s18  ;;  %s302_s17 = int_to_ptr.vmem [resolvable:$true] %s301_s17 }
  0x64   : > { %p1700_p12 = scmp.lt.s32.totalorder %s1691_s18, %s1691_s18 }
  0x65   : > { %p1694_p9 = pnand %p1692_p7, %p1972_p8 }
  0x66   : > { %p1701_p13 = por %p1700_p12, %p1699_p10 }
  0x67   : > { %p1695_p11 = pneg %p1694_p9 }
  0x69   : > { %p1702_p1 = pnand %p1701_p13, %p1695_p11 }
  0x6b   : > { %1705 = shalt.err (!%p1702_p1)
}
  0x6c   : > { %s1858_s19 = smov [#allocation12]   ;;  %s1706_s21 = scalar_lea.vmem %s302_s17, 16 }
  0x6d   : > { %1537 = dma.vmem_to_smem (!%p1962_p6), %s280_s22, 16, %s1858_s19, [#allocation11]  }
  0x6e   : > { %p1707_p4 = scmp.ne.s32.totalorder %s302_s17, %s1706_s21  ;;  %p1714_p5 = scmp.lt.s32.totalorder %s302_s17, %s302_s17 }
  0x6f   : > { %p1715_p3 = scmp.lt.s32.totalorder %s1706_s21, %s1706_s21 }
  0x70   : > { %p1709_p0 = pnand %p1707_p4, %p1972_p8 }
  0x71   : > { %p1716_p7 = por %p1715_p3, %p1714_p5 }
  0x72   : > { %p1710_p2 = pneg %p1709_p0 }
  0x74   : > { %p1717_p9 = pnand %p1716_p7, %p1710_p2 }
  0x76   : > { %1720 = shalt.err (!%p1717_p9)
}
  0x77   : > { %s1859_s16 = smov [#allocation15]   ;;  %s3247_s7 = sld [smem:[#allocation104_spill]] }
  0x78   : > { %1543 = dma.vmem_to_smem (!%p1962_p6), %s302_s17, 16, %s1859_s16, [#allocation14]  }
  0x7d   : > { %s312_s26 = sshll.u32 %s3247_s7, 4  ;;  %s313_s26 = int_to_ptr.vmem [resolvable:$true] %s312_s26 }
  0x7e   : > { %s1721_s9 = scalar_lea.vmem %s313_s26, 16  ;;  %p1729_p13 = scmp.lt.s32.totalorder %s313_s26, %s313_s26 }
  0x7f   : > { %p1722_p11 = scmp.ne.s32.totalorder %s313_s26, %s1721_s9  ;;  %p1730_p1 = scmp.lt.s32.totalorder %s1721_s9, %s1721_s9 }
  0x81   : > { %p1724_p10 = pnand %p1722_p11, %p1972_p8  ;;  %p1731_p3 = por %p1730_p1, %p1729_p13 }
  0x83   : > { %p1725_p12 = pneg %p1724_p10 }
  0x85   : > { %p1732_p4 = pnand %p1731_p3, %p1725_p12 }
  0x87   : > { %1735 = shalt.err (!%p1732_p4)
}
  0x88   : > { %s1860_s10 = smov [#allocation16]   ;;  %s1299_s24 = sadd.s32 4294967294, %s1852_s30  }
  0x89   : > { %1546 = dma.vmem_to_smem (!%p1962_p6), %s313_s26, 16, %s1860_s10, [#allocation17]  }
  0x8a   : > { %s2044_s14 = sadd.s32 1, %s1852_s30   ;;  %s36_s20 = sadd.s32 1, %s1848_s29 }
  0x8b   : > { %3248 = sst [smem:[#allocation31_spill]] %s2044_s14  ;;  %s33_s22 = ssub.s32 %s1852_s30, %s2044_s14 }
  0x8c   : > { %p43_p8 = scmp.ne.s32.totalorder %s1848_s29, %s1844_s28  ;;  %p34_p0 = scmp.eq.s32.totalorder %s33_s22, 0 }
  0x8d   : > { %p44_p2 = scmp.eq.s32.totalorder %s1852_s30, 0  ;;  %p49_p5 = scmp.ne.s32.totalorder %s1844_s28, %s1840_s27 }
  0x8e   : > { %p220_p7 = scmp.eq.s32.totalorder %s1940_s12, 1  ;;  %p3250_p11 = scmp.eq.s32.totalorder %s1940_s12, 0 }
  0x8f   : > { %s2056_s11 = scalar_select %p34_p0, %s1848_s29, %s36_s20  }
  0x90   : > { %p45_p9 = por %p44_p2, %p43_p8  ;;  %p2060_p10 = por %p3250_p11, %p49_p5 }
  0x91   : > { %3249 = sst [smem:[#allocation32_spill]] %s2056_s11  ;;  %p2064_p6 = por %p220_p7, %p43_p8 }
  0x92   : > { %p226_p12 = scmp.eq.s32.totalorder %s1299_s24, 1  ;;  %p1562_p13 = scmp.lt.s32.totalorder %s1852_s30, 2 }
  0x93   : > { %s3252_s17 = scalar_select %p2064_p6, 1, 0 }
  0x94   : > { %s323_s18 = sand.u32 1, %s1848_s29   ;;  %p2070_p1 = por %p226_p12, %p49_p5 }
  0x95   : > { %3253 = sst [smem:[#allocation33_spill]] %s3252_s17  ;;  %s1309_s21 = sshll.u32 %s323_s18, 5 }
  0x96   : > { %s3254_s19 = scalar_select %p2070_p1, 1, 0 }
  0x97   : > { %s1491_s16 = sshll.u32 %s1852_s30, 9  ;;  %s3256_s0 = sld [smem:[#allocation97_spill]] }
  0x98   : > { %3255 = sst [smem:[#allocation34_spill]] %s3254_s19  ;;  %s327_s9 = scalar_lea.vmem [#allocation3], %s1309_s21 }
  0x99   : > { %s334_s10 = sshll.u32 %s327_s9, 4  ;;  %p2080_p3 = pnand %p1562_p13, %p45_p9  ;;  %s2084_s10 = int_to_ptr.vmem [resolvable:$true] %s334_s10 }
  0x9a   : > { %s2086_s20 = scalar_lea.sflag [#allocation4], %s323_s18 }
  0x9b   : > { %p1738_p8 = pneg %p2080_p3 }
  0x9d   : > { %s2078_s26 = scalar_lea.hbm %s3256_s0, %s1491_s16  ;;  %s1741_s23 = scalar_lea.hbm %s3256_s0, 1024 }
  0x9e   : > { %s1736_s22 = scalar_lea.hbm %s2078_s26, 512  ;;  %p1742_p5 = scmp.lt.u32.totalorder %s2078_s26, %s3256_s0 }
  0x9f   : > { %p1737_p4 = scmp.ne.s32.totalorder %s2078_s26, %s1736_s22  ;;  %p1743_p7 = scmp.lt.u32.totalorder %s1741_s23, %s1736_s22 }
  0xa0   : > { %p1745_p11 = scmp.lt.u32.totalorder %s1736_s22, %s2078_s26 }
  0xa1   : > { %p1739_p0 = pnand %p1738_p8, %p1737_p4  ;;  %p1744_p9 = por %p1743_p7, %p1742_p5 }
  0xa3   : > { %p1740_p2 = pneg %p1739_p0  ;;  %p1746_p12 = por %p1745_p11, %p1744_p9 }
  0xa5   : > { %p1747_p13 = pnand %p1746_p12, %p1740_p2 }
  0xa7   : > { %1750 = shalt.err (!%p1747_p13)
}
  0xa8   : > { %s1751_s18 = scalar_lea.vmem %s2084_s10, 512  ;;  %s1861_s21 = smov [#allocation3]  }
  0xa9   : > { %p1752_p4 = scmp.ne.s32.totalorder %s2084_s10, %s1751_s18  ;;  %s1756_s16 = sshll.u32 %s1861_s21, 4  ;;  %s1757_s16 = int_to_ptr.vmem [resolvable:$false] %s1756_s16 }
  0xaa   : > { %s1758_s25 = scalar_lea.vmem %s1757_s16, 1024  ;;  %p1759_p6 = scmp.lt.s32.totalorder %s2084_s10, %s1757_s16 }
  0xab   : > { %p1754_p0 = pnand %p1752_p4, %p1738_p8  ;;  %p1760_p5 = scmp.lt.s32.totalorder %s1758_s25, %s1751_s18 }
  0xad   : > { %p1755_p1 = pneg %p1754_p0  ;;  %p1761_p7 = por %p1760_p5, %p1759_p6 }
  0xaf   : > { %p1762_p9 = pnand %p1761_p7, %p1755_p1 }
  0xb1   : > { %1765 = shalt.err (!%p1762_p9)
}
  0xb2   : > { %s1862_s22 = smov 128   ;;  %s1863_s23 = smov 8  }
  0xb3   : > { %1550 = dma.hbm_to_vmem [thread:$0]  (!%p2080_p3), %s2078_s26, 512, %s2084_s10, %s2086_s20, %s1862_s22, %s1862_s22, %s1863_s23  }
  0xb4   : > { %p3258_p8 = scmp.ne.s32.totalorder %s3239_s13, 0 }
  0xb6   : > { %346 = sbr.rel (%p3258_p8) target bundleno = 554 (0x22a), region = 52 }
  0xbd   : > { %s2117_s9 = sand.u32 1, %s1844_s28  }
  0xbe   : > { %3259 = sst [smem:[#allocation35_spill]] %s2117_s9  ;;  %s3134_s18 = sshll.u32 %s2117_s9, 5 }
  0xbf   : > { %s349_s21 = scalar_lea.sflag [#allocation4], %s2117_s9  ;;  %s352_s16 = scalar_lea.vmem [#allocation3], %s3134_s18 }
  0xc0   : > { %1811 = dma.done.wait (%p2060_p10), %s349_s21, 512  }
  0xc1   : > { %1813 = vsyncadd (%p2060_p10), %s349_s21, 4294966784  ;;  %p3260_p6 = scmp.eq.s32.totalorder %s1940_s12, 0 }
  0xc3   : > { %1815 = dma.done.wait (%p3260_p6), [#allocation8], 128   ;;  %p3261_p1 = pmov %p3260_p6 }
  0xc5   : > { %1817 = vsyncadd (%p3261_p1), [#allocation8], 4294967168  ;;  %p3262_p3 = pmov %p3261_p1 }
  0xc6   : > { %p3263_p2 = pmov %p3261_p1 }
  0xc7   : > { %1819 = dma.done.wait (%p3262_p3), [#allocation6], 16  }
  0xc8   : > { %1821 = vsyncadd (%p3263_p2), [#allocation6], 4294967280  ;;  %p3264_p11 = pmov %p3261_p1 }
  0xc9   : > { %p3265_p12 = pmov %p3261_p1 }
  0xca   : > { %1823 = dma.done.wait (%p3264_p11), [#allocation11], 32  }
  0xcb   : > { %1825 = vsyncadd (%p3265_p12), [#allocation11], 4294967264  ;;  %p3266_p10 = pmov %p3261_p1 }
  0xcc   : > { %p3267_p13 = pmov %p3261_p1 }
  0xcd   : > { %1827 = dma.done.wait (%p3266_p10), [#allocation14], 32  }
  0xce   : > { %1829 = vsyncadd (%p3267_p13), [#allocation14], 4294967264  ;;  %p3268_p4 = pmov %p3261_p1 }
  0xcf   : > { %p3269_p0 = pmov %p3261_p1 }
  0xd0   : > { %1831 = dma.done.wait (%p3268_p4), [#allocation17], 16  }
  0xd1   : > { %1833 = vsyncadd (%p3269_p0), [#allocation17], 4294967280 }
  0xd2   : > { %385 = sfence }
  0xd3   : > { %v2147_v0 = vld [vmem:[%s352_s16] sm:$0xff]  ;;  %v2149_v1 = vld [vmem:[%s352_s16 + $0x8] sm:$0xff]  ;;  %s1864_s13 = smov 1   ;;  %s1865_s15 = smov 127   ;;  %v2155_v2 = vld [vmem:[%s352_s16 + $0x10] sm:$0xff]  ;;  %v426_v4 = vlaneseq }
  0xd4   : > { %424 = vrot.lane.b32.xlu0 %v2147_v0, %s1864_s13  ;;  %488 = vrot.lane.b32.xlu1 %v2149_v1, %s1864_s13  ;;  %v2159_v3 = vld [vmem:[%s352_s16 + $0x18] sm:$0xff]  ;;  %s2163_s26 = sld [smem:[#allocation9]]  ;;  %s2165_s10 = sld [smem:[#allocation9 + $0xc]]  ;;  %v2213_v8 = vld [vmem:[#allocation7] sm:$0xff] }
  0xd5   : > { %s2167_s24 = sld [smem:[#allocation9 + $0x18]]  ;;  %s2169_s20 = sld [smem:[#allocation9 + $0x24]]  ;;  %v2189_v5 = vshrl.u32 %v426_v4, 7 }
  0xd6   : > { %s2171_s25 = sld [smem:[#allocation10]]  ;;  %s2173_s22 = sld [smem:[#allocation10 + $0x1]] }
  0xd7   : > { %s2175_s23 = sld [smem:[#allocation10 + $0x2]]  ;;  %s2177_s21 = sld [smem:[#allocation10 + $0x3]]  ;;  %v428_v6 = vsub.s32 0, %v2189_v5  ;;  %v467_v7 = vsub.s32 2, %v2189_v5 }
  0xd8   : > { %463 = vrot.lane.b32.xlu0 %v2147_v0, %s1865_s15  ;;  %523 = vrot.lane.b32.xlu1 %v2149_v1, %s1865_s15  ;;  %s2179_s16 = sld [smem:[#allocation9 + $0x1]]  ;;  %s2185_s18 = sld [smem:[#allocation9 + $0x25]] }
  0xd9   : > { %s2187_s0 = sld [smem:[#allocation9 + $0x2]]  ;;  %s2191_s1 = sld [smem:[#allocation9 + $0xe]]  ;;  %v2228_v9 = vrot.slane %v2213_v8, %v428_v6  ;;  %v2232_v11 = vrot.slane %v2213_v8, %v467_v7 }
  0xda   : > { %s2193_s2 = sld [smem:[#allocation9 + $0x1a]]  ;;  %s2195_s3 = sld [smem:[#allocation9 + $0x26]]  ;;  %v432_v12 = vstv %s2163_s26  ;;  %v436_v13 = vstv %s2165_s10 }
  0xdb   : > { %s2197_s4 = sld [smem:[#allocation9 + $0x3]]  ;;  %s2199_s5 = sld [smem:[#allocation9 + $0xf]]  ;;  %v440_v14 = vstv %s2167_s24  ;;  %v444_v16 = vstv %s2169_s20 }
  0xdc   : > { %544 = vrot.lane.b32.xlu0 %v2155_v2, %s1864_s13  ;;  %579 = vrot.lane.b32.xlu1 %v2155_v2, %s1865_s15  ;;  %3270 = sst [smem:[#allocation36_spill]] %s2171_s25  ;;  %s2201_s6 = sld [smem:[#allocation9 + $0x1b]]  ;;  %v416_v17 = vstv %s2171_s25  ;;  %v418_v18 = vstv %s2173_s22 }
  0xdd   : > { %3271 = sst [smem:[#allocation37_spill]] %s2177_s21  ;;  %s2203_s7 = sld [smem:[#allocation9 + $0x27]]  ;;  %v420_v20 = vstv %s2175_s23  ;;  %v422_v21 = vstv %s2177_s21 }
  0xde   : > { %s2205_s11 = sld [smem:[#allocation9 + $0x4]]  ;;  %s2209_s29 = sld [smem:[#allocation9 + $0x10]]  ;;  %v448_v10 = vstv %s2179_s16  ;;  %v460_v22 = vstv %s2185_s18 }
  0xdf   : > { %3272 = sst [smem:[#allocation38_spill]] %s2187_s0  ;;  %s2215_s14 = sld [smem:[#allocation9 + $0x28]]  ;;  %v2258_v23 = vmul.f32 %v448_v10, %v2147_v0  ;;  %v471_v24 = vstv %s2187_s0  ;;  %v475_v25 = vstv %s2191_s1  ;;  %v2287_v34 = vmul.f32 %v460_v22, %v2147_v0 }
  0xe0   : > { %600 = vrot.lane.b32.xlu0 %v2159_v3, %s1864_s13  ;;  %635 = vrot.lane.b32.xlu1 %v2159_v3, %s1865_s15  ;;  %s2181_s13 = sld [smem:[#allocation9 + $0xd]]  ;;  %s2183_s15 = sld [smem:[#allocation9 + $0x19]]  ;;  %v479_v32 = vstv %s2193_s2  ;;  %v483_v33 = vstv %s2195_s3 }
  0xe1   : > { %3273 = sst [smem:[#allocation39_spill]] %s2191_s1  ;;  %s2211_s28 = sld [smem:[#allocation9 + $0x1c]]  ;;  %v492_v35 = vstv %s2197_s4  ;;  %v496_v36 = vstv %s2199_s5 }
  0xe2   : > { %s2217_s30 = sld [smem:[#allocation9 + $0x5]]  ;;  %s2219_s19 = sld [smem:[#allocation9 + $0x11]]  ;;  %v500_v37 = vstv %s2201_s6 }
  0xe3   : > { %s2221_s27 = sld [smem:[#allocation9 + $0x1d]]  ;;  %s2223_s8 = sld [smem:[#allocation9 + $0x29]]  ;;  %v504_v38 = vstv %s2203_s7 }
  0xe4   : > { %s2225_s17 = sld [smem:[#allocation9 + $0x6]]  ;;  %s2234_s9 = sld [smem:[#allocation9 + $0x7]]  ;;  %v508_v27 = vstv %s2205_s11  ;;  %v512_v29 = vstv %s2209_s29 }
  0xe5   : > { %s2236_s12 = sld [smem:[#allocation9 + $0x13]]  ;;  %s2250_s16 = sld [smem:[#allocation9 + $0x12]]  ;;  %v520_v31 = vstv %s2215_s14  ;;  %v2298_v39 = vmul.f32 %v2149_v1, %v508_v27  ;;  %v2301_v40 = vmul.f32 %v2149_v1, %v512_v29 }
  0xe6   : > { %v452_v15 = vstv %s2181_s13  ;;  %v456_v19 = vstv %s2183_s15  ;;  %s2260_s13 = sld [smem:[#allocation9 + $0x2a]]  ;;  %s2262_s25 = sld [smem:[#allocation9 + $0x8]]  ;;  %v2307_v42 = vmul.f32 %v2149_v1, %v520_v31 }
  0xe7   : > { %v2267_v26 = vmul.f32 %v452_v15, %v2147_v0  ;;  %s2270_s15 = sld [smem:[#allocation9 + $0x14]]  ;;  %s2272_s18 = sld [smem:[#allocation9 + $0x20]]  ;;  %v2275_v28 = vmul.f32 %v456_v19, %v2147_v0  ;;  %v516_v30 = vstv %s2211_s28 }
  0xe8   : > { %s2280_s0 = sld [smem:[#allocation9 + $0x2c]]  ;;  %s2282_s1 = sld [smem:[#allocation9 + $0x9]]  ;;  %v2304_v41 = vmul.f32 %v2149_v1, %v516_v30  ;;  %v527_v44 = vstv %s2217_s30  ;;  %v531_v48 = vstv %s2219_s19 }
  0xe9   : > { %3274 = sst [smem:[#allocation40_spill]] %s2221_s27  ;;  %s2290_s11 = sld [smem:[#allocation9 + $0x15]] }
  0xea   : > { %3275 = sst [smem:[#allocation41_spill]] %s2223_s8  ;;  %s2244_s8 = sld [smem:[#allocation9 + $0x2b]]  ;;  %v564_v43 = vstv %s2234_s9 }
  0xeb   : > { %3276 = sst [smem:[#allocation42_spill]] %s2225_s17  ;;  %s2242_s17 = sld [smem:[#allocation9 + $0x1f]]  ;;  %v568_v45 = vstv %s2236_s12  ;;  %v552_v52 = vstv %s2250_s16  ;;  %v2326_v55 = vmul.f32 %v2155_v2, %v564_v43 }
  0xec   : > { %s2252_s27 = sld [smem:[#allocation9 + $0x1e]]  ;;  %s2292_s28 = sld [smem:[#allocation9 + $0x21]]  ;;  %v560_v54 = vstv %s2260_s13  ;;  %v2329_v58 = vmul.f32 %v2155_v2, %v568_v45  ;;  %v583_v61 = vstv %s2262_s25 }
  0xed   : > { %s3277_s29 = sld [smem:[#allocation40_spill]]  ;;  %s3278_s14 = sld [smem:[#allocation41_spill]]  ;;  %v587_v0 = vstv %s2270_s15  ;;  %v591_v1 = vstv %s2272_s18 }
  0xee   : > { %s3279_s21 = sld [smem:[#allocation42_spill]]  ;;  %s2310_s4 = sld [smem:[#allocation9 + $0x2d]]  ;;  %v595_v4 = vstv %s2280_s0  ;;  %v604_v6 = vstv %s2282_s1 }
  0xef   : > { %s2312_s5 = sld [smem:[#allocation9 + $0xa]]  ;;  %s2342_s6 = sld [smem:[#allocation9 + $0x16]] }
  0xf0   : > { %v576_v47 = vstv %s2244_s8  ;;  %s2344_s8 = sld [smem:[#allocation9 + $0x22]]  ;;  %s2374_s19 = sld [smem:[#allocation9 + $0x2e]] }
  0xf1   : > { %v572_v46 = vstv %s2242_s17  ;;  %v2335_v60 = vmul.f32 %v2155_v2, %v576_v47  ;;  %s2376_s9 = sld [smem:[#allocation9 + $0xb]]  ;;  %s2413_s2 = sld [smem:[#allocation9 + $0x17]] }
  0xf2   : > { %v556_v53 = vstv %s2252_s27  ;;  %v2332_v59 = vmul.f32 %v2155_v2, %v572_v46  ;;  %v608_v2 = vstv %s2290_s11  ;;  %v612_v7 = vstv %s2292_s28  ;;  %s1373_s0 = sld [smem:[#allocation9 + $0x23]]  ;;  %s1374_s1 = sld [smem:[#allocation9 + $0x2f]] }
  0xf3   : > { %v535_v49 = vstv %s3277_s29  ;;  %v539_v50 = vstv %s3278_s14  ;;  %s1866_s3 = smov 120   ;;  %s3153_s27 = smov 8  }
  0xf4   : > { %v548_v51 = vstv %s3279_s21  ;;  %v616_v43 = vstv %s2310_s4  ;;  %s2455_s26 = sld [smem:[#allocation12 + $0x2]]  ;;  %s2457_s10 = sld [smem:[#allocation12 + $0x1]] }
  0xf5   : > { %v620_v45 = vstv %s2312_s5  ;;  %s2459_s24 = sld [smem:[#allocation12 + $0xe]]  ;;  %s2461_s20 = sld [smem:[#allocation12 + $0x1a]] }
  0xf6   : > { %s2463_s25 = sld [smem:[#allocation12 + $0x26]]  ;;  %s2465_s22 = sld [smem:[#allocation12 + $0xd]] }
  0xf7   : > { %s2467_s23 = sld [smem:[#allocation12 + $0x19]]  ;;  %s2469_s21 = sld [smem:[#allocation12 + $0x25]] }
  0xf8   : > { %s2471_s16 = sld [smem:[#allocation12 + $0x4]]  ;;  %s2473_s13 = sld [smem:[#allocation12 + $0x10]] }
  0xf9   : > { %s2475_s15 = sld [smem:[#allocation12 + $0x1c]]  ;;  %s2477_s18 = sld [smem:[#allocation12 + $0x28]] }
  0xfa   : > { %3284 = sst [smem:[#allocation40_spill]] %s2455_s26  ;;  %s2479_s11 = sld [smem:[#allocation12 + $0x7]] }
  0xfb   : > { %3285 = sst [smem:[#allocation41_spill]] %s2459_s24  ;;  %s2481_s28 = sld [smem:[#allocation12 + $0x13]] }
  0xfc   : > { %3286 = sst [smem:[#allocation42_spill]] %s2461_s20  ;;  %s2483_s29 = sld [smem:[#allocation12 + $0x1f]] }
  0xfd   : > { %3287 = sst [smem:[#allocation36_spill]] %s2463_s25  ;;  %s2485_s14 = sld [smem:[#allocation12 + $0x2b]] }
  0xfe   : > { %s2487_s4 = sld [smem:[#allocation12 + $0xa]]  ;;  %s2489_s5 = sld [smem:[#allocation12 + $0x16]] }
  0xff   : > { %s2493_s7 = sld [smem:[#allocation12 + $0x2e]]  ;;  %s2497_s30 = sld [smem:[#allocation12 + $0xc]] }
 0x100   : > { %s2499_s12 = sld [smem:[#allocation12 + $0x18]]  ;;  %s2501_s17 = sld [smem:[#allocation12 + $0x24]] }
 0x104   : > { %3288 = sst [smem:[#allocation37_spill]] %s2487_s4 }
 0x105   : > { %3289 = sst [smem:[#allocation38_spill]] %s2493_s7 }
 0x106   : > { %3291 = sst [smem:[#allocation43_spill]] %s2497_s30 }
 0x107   : > { %3292 = sst [smem:[#allocation44_spill]] %s2499_s12  ;;  %s2517_s30 = sld [smem:[#allocation12 + $0x29]] }
 0x108   : > { %3293 = sst [smem:[#allocation45_spill]] %s2501_s17  ;;  %s2521_s17 = sld [smem:[#allocation12 + $0xf]] }
 0x109   : > { %s2519_s12 = sld [smem:[#allocation12 + $0x3]] }
 0x10d   : > { %3301 = sst [smem:[#allocation53_spill]] %s2517_s30  ;;  %s2532_s30 = sld [smem:[#allocation12 + $0x20]] }
 0x10e   : > { %3303 = sst [smem:[#allocation55_spill]] %s2521_s17  ;;  %s2538_s17 = sld [smem:[#allocation12 + $0x12]] }
 0x10f   : > { %3302 = sst [smem:[#allocation54_spill]] %s2519_s12 }
 0x110   : > { %s2534_s12 = sld [smem:[#allocation12 + $0x2c]] }
 0x113   : > { %3308 = sst [smem:[#allocation60_spill]] %s2532_s30 }
 0x114   : > { %3311 = sst [smem:[#allocation63_spill]] %s2538_s17 }
 0x116   : > { %3309 = sst [smem:[#allocation61_spill]] %s2534_s12 }
 0x117   : > { %s2550_s12 = sld [smem:[#allocation12 + $0xb]] }
 0x11d   : > { %3314 = sst [smem:[#allocation66_spill]] %s2550_s12  ;;  %s2765_s12 = sld [smem:[#allocation15 + $0x7]] }
 0x146   : > { %v425_v56 = vpop.permute.xlu0 %424  ;;  %v489_v57 = vpop.permute.xlu1 %488 }
 0x147   : > { %v430_v62 = vmul.f32 %v2228_v9, %v425_v56  ;;  %v490_v63 = vmul.f32 %v489_v57, %v2228_v9 }
 0x149   : > { %v433_v10 = vmul.f32 %v432_v12, %v430_v62  ;;  %v437_v15 = vmul.f32 %v436_v13, %v430_v62  ;;  %v441_v19 = vmul.f32 %v440_v14, %v430_v62  ;;  %v445_v22 = vmul.f32 %v444_v16, %v430_v62 }
 0x14a   : > { %v464_v27 = vpop.permute.xlu0 %463  ;;  %v493_v29 = vmul.f32 %v492_v35, %v490_v63  ;;  %v497_v30 = vmul.f32 %v496_v36, %v490_v63  ;;  %v524_v31 = vpop.permute.xlu1 %523  ;;  %v501_v16 = vmul.f32 %v500_v37, %v490_v63  ;;  %v505_v35 = vmul.f32 %v504_v38, %v490_v63 }
 0x14b   : > { %v434_v46 = vadd.f32 %v433_v10, %v416_v17  ;;  %v438_v47 = vadd.f32 %v437_v15, %v418_v18  ;;  %v442_v12 = vadd.f32 %v441_v19, %v420_v20  ;;  %v446_v13 = vadd.f32 %v445_v22, %v422_v21 }
 0x14c   : > { %v469_v14 = vmul.f32 %v2232_v11, %v464_v27  ;;  %v525_v36 = vmul.f32 %v524_v31, %v2232_v11 }
 0x14d   : > { %v450_v56 = vadd.f32 %v2258_v23, %v434_v46  ;;  %v454_v17 = vadd.f32 %v2267_v26, %v438_v47  ;;  %v458_v57 = vadd.f32 %v2275_v28, %v442_v12  ;;  %v462_v18 = vadd.f32 %v2287_v34, %v446_v13 }
 0x14e   : > { %v472_v20 = vmul.f32 %v471_v24, %v469_v14  ;;  %v476_v21 = vmul.f32 %v475_v25, %v469_v14  ;;  %v480_v37 = vmul.f32 %v479_v32, %v469_v14  ;;  %v484_v38 = vmul.f32 %v483_v33, %v469_v14  ;;  %v545_v62 = vpop.permute.xlu0 %544  ;;  %v580_v23 = vpop.permute.xlu1 %579 }
 0x14f   : > { %v528_v63 = vmul.f32 %v527_v44, %v525_v36  ;;  %v532_v26 = vmul.f32 %v531_v48, %v525_v36  ;;  %v624_v28 = vstv %s2342_s6  ;;  %v628_v34 = vstv %s2344_s8  ;;  %s2491_s6 = sld [smem:[#allocation12 + $0x22]]  ;;  %s2495_s8 = sld [smem:[#allocation12]] }
 0x150   : > { %v473_v10 = vadd.f32 %v472_v20, %v450_v56  ;;  %v477_v15 = vadd.f32 %v476_v21, %v454_v17  ;;  %v481_v19 = vadd.f32 %v480_v37, %v458_v57  ;;  %v485_v24 = vadd.f32 %v484_v38, %v462_v18 }
 0x151   : > { %v536_v22 = vmul.f32 %v535_v49, %v525_v36  ;;  %v540_v25 = vmul.f32 %v539_v50, %v525_v36  ;;  %v546_v32 = vmul.f32 %v545_v62, %v2228_v9  ;;  %v581_v33 = vmul.f32 %v580_v23, %v2232_v11 }
 0x152   : > { %v494_v44 = vadd.f32 %v493_v29, %v473_v10  ;;  %v498_v48 = vadd.f32 %v497_v30, %v477_v15  ;;  %v502_v27 = vadd.f32 %v501_v16, %v481_v19  ;;  %v506_v31 = vadd.f32 %v505_v35, %v485_v24  ;;  %v601_v14 = vpop.permute.xlu0 %600  ;;  %v636_v16 = vpop.permute.xlu1 %635 }
 0x153   : > { %v549_v46 = vmul.f32 %v548_v51, %v546_v32  ;;  %v553_v47 = vmul.f32 %v552_v52, %v546_v32  ;;  %v557_v12 = vmul.f32 %v556_v53, %v546_v32  ;;  %v561_v49 = vmul.f32 %v560_v54, %v546_v32 }
 0x154   : > { %v510_v50 = vadd.f32 %v2298_v39, %v494_v44  ;;  %v514_v13 = vadd.f32 %v2301_v40, %v498_v48  ;;  %v518_v29 = vadd.f32 %v2304_v41, %v502_v27  ;;  %v522_v30 = vadd.f32 %v2307_v42, %v506_v31 }
 0x155   : > { %v584_v51 = vmul.f32 %v583_v61, %v581_v33  ;;  %v588_v52 = vmul.f32 %v587_v0, %v581_v33  ;;  %v632_v53 = vstv %s2374_s19  ;;  %v639_v35 = vstv %s2376_s9  ;;  %3290 = sst [smem:[#allocation39_spill]] %s2495_s8  ;;  %s2503_s19 = sld [smem:[#allocation13]] }
 0x156   : > { %v529_v54 = vadd.f32 %v528_v63, %v510_v50  ;;  %v533_v39 = vadd.f32 %v532_v26, %v514_v13  ;;  %v537_v36 = vadd.f32 %v536_v22, %v518_v29  ;;  %v541_v40 = vadd.f32 %v540_v25, %v522_v30  ;;  %s2505_s9 = sld [smem:[#allocation13 + $0x1]]  ;;  %s2523_s8 = sld [smem:[#allocation12 + $0x1b]] }
 0x157   : > { %v592_v41 = vmul.f32 %v591_v1, %v581_v33  ;;  %v596_v42 = vmul.f32 %v595_v4, %v581_v33  ;;  %v602_v56 = vmul.f32 %v601_v14, %v2228_v9  ;;  %v637_v61 = vmul.f32 %v636_v16, %v2232_v11 }
 0x158   : > { %v550_v0 = vadd.f32 %v549_v46, %v529_v54  ;;  %v554_v17 = vadd.f32 %v553_v47, %v533_v39  ;;  %v558_v57 = vadd.f32 %v557_v12, %v537_v36  ;;  %v562_v18 = vadd.f32 %v561_v49, %v541_v40 }
 0x159   : > { %v605_v20 = vmul.f32 %v604_v6, %v602_v56  ;;  %v609_v21 = vmul.f32 %v608_v2, %v602_v56  ;;  %v613_v37 = vmul.f32 %v612_v7, %v602_v56  ;;  %v617_v1 = vmul.f32 %v616_v43, %v602_v56 }
 0x15a   : > { %v566_v4 = vadd.f32 %v2326_v55, %v550_v0  ;;  %v570_v9 = vadd.f32 %v2329_v58, %v554_v17  ;;  %v574_v38 = vadd.f32 %v2332_v59, %v558_v57  ;;  %v578_v11 = vadd.f32 %v2335_v60, %v562_v18 }
 0x15b   : > { %v621_v62 = vmul.f32 %v2159_v3, %v620_v45  ;;  %v625_v6 = vmul.f32 %v2159_v3, %v624_v28  ;;  %v629_v2 = vmul.f32 %v2159_v3, %v628_v34  ;;  %v633_v7 = vmul.f32 %v2159_v3, %v632_v53  ;;  %3294 = sst [smem:[#allocation46_spill]] %s2503_s19 }
 0x15c   : > { %v585_v43 = vadd.f32 %v584_v51, %v566_v4  ;;  %v589_v23 = vadd.f32 %v588_v52, %v570_v9  ;;  %v593_v55 = vadd.f32 %v592_v41, %v574_v38  ;;  %v597_v63 = vadd.f32 %v596_v42, %v578_v11  ;;  %3295 = sst [smem:[#allocation47_spill]] %s2505_s9 }
 0x15d   : > { %v640_v58 = vmul.f32 %v639_v35, %v637_v61  ;;  %v643_v60 = vstv %s2413_s2  ;;  %v647_v3 = vstv %s1373_s0  ;;  %v651_v33 = vstv %s1374_s1  ;;  %s2507_s2 = sld [smem:[#allocation13 + $0x2]]  ;;  %s2509_s0 = sld [smem:[#allocation13 + $0x3]] }
 0x15e   : > { %v606_v26 = vadd.f32 %v605_v20, %v585_v43  ;;  %v610_v59 = vadd.f32 %v609_v21, %v589_v23  ;;  %v614_v10 = vadd.f32 %v613_v37, %v593_v55  ;;  %v618_v15 = vadd.f32 %v617_v1, %v597_v63  ;;  %s2511_s1 = sld [smem:[#allocation12 + $0x5]]  ;;  %3304 = sst [smem:[#allocation56_spill]] %s2523_s8 }
 0x15f   : > { %v644_v34 = vmul.f32 %v643_v60, %v637_v61  ;;  %v648_v32 = vmul.f32 %v647_v3, %v637_v61  ;;  %v652_v48 = vmul.f32 %v651_v33, %v637_v61  ;;  %v713_v31 = vsub.s32 5, %v2189_v5  ;;  %s2542_s8 = sld [smem:[#allocation12 + $0x2a]] }
 0x160   : > { %v622_v19 = vadd.f32 %v621_v62, %v606_v26  ;;  %v626_v45 = vadd.f32 %v625_v6, %v610_v59  ;;  %v630_v24 = vadd.f32 %v629_v2, %v614_v10  ;;  %v634_v28 = vadd.f32 %v633_v7, %v618_v15 }
 0x161   : > { %v2545_v46 = vrot.slane %v2213_v8, %v713_v31  ;;  %v717_v47 = vstv %s2455_s26  ;;  %v721_v12 = vstv %s2459_s24  ;;  %v694_v49 = vstv %s2457_s10  ;;  %s2560_s26 = sld [smem:[#allocation12 + $0x2f]]  ;;  %s2566_s10 = sld [smem:[#allocation12 + $0x9]] }
 0x162   : > { %v2435_v22 = vadd.f32 %v640_v58, %v622_v19  ;;  %v2440_v25 = vadd.f32 %v644_v34, %v626_v45  ;;  %v2445_v44 = vadd.f32 %v648_v32, %v630_v24  ;;  %v2450_v27 = vadd.f32 %v652_v48, %v634_v28  ;;  %s2582_s24 = sld [smem:[#allocation16]] }
 0x163   : > { %3296 = sst [smem:[#allocation48_spill]] %s2507_s2  ;;  %s2525_s2 = sld [smem:[#allocation12 + $0x27]]  ;;  %v725_v50 = vstv %s2461_s20  ;;  %v729_v13 = vstv %s2463_s25  ;;  %v698_v29 = vstv %s2465_s22  ;;  %v702_v30 = vstv %s2467_s23 }
 0x164   : > { %709 = vrot.lane.b32.xlu1 %v2435_v22, %s1866_s3  ;;  %670 = vrot.lane.b32.xlu0 %v2435_v22, %s3153_s27  ;;  %3297 = sst [smem:[#allocation49_spill]] %s2509_s0  ;;  %v674_v14 = vsub.s32 3, %v2189_v5  ;;  %v706_v16 = vstv %s2469_s21  ;;  %v753_v51 = vstv %s2471_s16  ;;  %s2568_s22 = sld [smem:[#allocation12 + $0x15]]  ;;  %v2621_v6 = vmul.f32 %v694_v49, %v2435_v22 }
 0x165   : > { %3298 = sst [smem:[#allocation50_spill]] %s2511_s1  ;;  %s2536_s1 = sld [smem:[#allocation12 + $0x6]]  ;;  %v757_v52 = vstv %s2473_s13  ;;  %v761_v53 = vstv %s2475_s15  ;;  %v765_v35 = vstv %s2477_s18  ;;  %v808_v54 = vstv %s2479_s11 }
 0x166   : > { %3313 = sst [smem:[#allocation65_spill]] %s2542_s8  ;;  %s2558_s8 = sld [smem:[#allocation12 + $0x23]]  ;;  %v812_v39 = vstv %s2481_s28  ;;  %v816_v36 = vstv %s2483_s29  ;;  %v820_v40 = vstv %s2485_s14  ;;  %v863_v41 = vstv %s2487_s4 }
 0x167   : > { %3317 = sst [smem:[#allocation69_spill]] %s2560_s26  ;;  %s3320_s23 = sld [smem:[#allocation48_spill]]  ;;  %v867_v42 = vstv %s2489_s5  ;;  %v662_v56 = vstv %s2503_s19  ;;  %v664_v61 = vstv %s2505_s9  ;;  %v871_v0 = vstv %s2491_s6 }
 0x168   : > { %768 = vrot.lane.b32.xlu1 %v2440_v25, %s1866_s3  ;;  %733 = vrot.lane.b32.xlu0 %v2440_v25, %s3153_s27  ;;  %3318 = sst [smem:[#allocation70_spill]] %s2566_s10  ;;  %s2574_s25 = sld [smem:[#allocation12 + $0x21]]  ;;  %v875_v17 = vstv %s2493_s7  ;;  %v668_v18 = vstv %s2509_s0  ;;  %v2597_v20 = vrot.slane %v2213_v8, %v674_v14  ;;  %v2624_v2 = vmul.f32 %v698_v29, %v2435_v22 }
 0x169   : > { %3305 = sst [smem:[#allocation57_spill]] %s2525_s2  ;;  %s2540_s2 = sld [smem:[#allocation12 + $0x1e]]  ;;  %v2633_v23 = vmul.f32 %v702_v30, %v2435_v22  ;;  %v2636_v55 = vmul.f32 %v706_v16, %v2435_v22  ;;  %v2640_v58 = vmul.f32 %v753_v51, %v2440_v25  ;;  %v2647_v26 = vmul.f32 %v757_v52, %v2440_v25 }
 0x16a   : > { %3319 = sst [smem:[#allocation71_spill]] %s2568_s22  ;;  %s3324_s16 = sld [smem:[#allocation43_spill]]  ;;  %v2650_v59 = vmul.f32 %v761_v53, %v2440_v25  ;;  %v2653_v10 = vmul.f32 %v765_v35, %v2440_v25  ;;  %v835_v19 = vstv %s2532_s30  ;;  %v906_v45 = vadd.s32 4294967295, %v2189_v5 }
 0x16b   : > { %3310 = sst [smem:[#allocation62_spill]] %s2536_s1  ;;  %s2552_s1 = sld [smem:[#allocation12 + $0x17]]  ;;  %v912_v24 = vadd.s32 1, %v2189_v5  ;;  %v796_v34 = vstv %s2538_s17  ;;  %v2680_v5 = vmul.f32 %v808_v54, %v2445_v44  ;;  %v2685_v32 = vmul.f32 %v812_v39, %v2445_v44 }
 0x16c   : > { %823 = vrot.lane.b32.xlu1 %v2445_v44, %s1866_s3  ;;  %788 = vrot.lane.b32.xlu0 %v2445_v44, %s3153_s27  ;;  %3316 = sst [smem:[#allocation68_spill]] %s2558_s8  ;;  %s2576_s20 = sld [smem:[#allocation12 + $0x2d]]  ;;  %v2690_v33 = vmul.f32 %v816_v36, %v2445_v44  ;;  %v2699_v48 = vmul.f32 %v820_v40, %v2445_v44  ;;  %v2711_v30 = vmul.f32 %v863_v41, %v2450_v27  ;;  %vm907_vm0 = vcmp.ge.s32.totalorder %v906_v45, 0 }
 0x16d   : > { %s3323_s21 = sld [smem:[#allocation39_spill]]  ;;  %s3325_s13 = sld [smem:[#allocation44_spill]]  ;;  %v666_v57 = vstv %s3320_s23  ;;  %vm914_vm1 = vcmp.lt.s32.totalorder %v912_v24, 8  ;;  %v2722_v16 = vmul.f32 %v867_v42, %v2450_v27  ;;  %v2727_v51 = vmul.f32 %v871_v0, %v2450_v27 }
 0x16e   : > { %3321 = sst [smem:[#allocation72_spill]] %s2574_s25  ;;  %s3327_s22 = sld [smem:[#allocation45_spill]]  ;;  %v2739_v54 = vmul.f32 %v875_v17, %v2450_v27  ;;  %v1868_v39 = vmov 0.0  }
 0x16f   : > { %3312 = sst [smem:[#allocation64_spill]] %s2540_s2  ;;  %s2584_s15 = sld [smem:[#allocation16 + $0x1]]  ;;  %v800_v3 = vstv %s2540_s2  ;;  %v2746_v36 = vsel %vm907_vm0, 1.0, %v1868_v39  ;;  %v2749_v40 = vsel %vm914_vm1, 1.0, %v1868_v39 }
 0x170   : > { %878 = vrot.lane.b32.xlu1 %v2450_v27, %s1866_s3  ;;  %843 = vrot.lane.b32.xlu0 %v2450_v27, %s3153_s27  ;;  %s2513_s3 = sld [smem:[#allocation12 + $0x11]]  ;;  %s2515_s27 = sld [smem:[#allocation12 + $0x1d]]  ;;  %v682_v37 = vstv %s3324_s16 }
 0x171   : > { %3315 = sst [smem:[#allocation67_spill]] %s2552_s1  ;;  %s3329_s18 = sld [smem:[#allocation50_spill]] }
 0x172   : > { %3322 = sst [smem:[#allocation73_spill]] %s2576_s20  ;;  %s2590_s20 = sld [smem:[#allocation16 + $0x2]] }
 0x173   : > { %3326 = sst [smem:[#allocation74_spill]] %s2582_s24  ;;  %s3333_s26 = sld [smem:[#allocation53_spill]]  ;;  %v678_v21 = vstv %s3323_s21  ;;  %v686_v1 = vstv %s3325_s13 }
 0x174   : > { %s2592_s8 = sld [smem:[#allocation16 + $0x3]]  ;;  %s3335_s4 = sld [smem:[#allocation54_spill]]  ;;  %v690_v4 = vstv %s3327_s22 }
 0x175   : > { %3328 = sst [smem:[#allocation75_spill]] %s2584_s15  ;;  %s2600_s15 = sld [smem:[#allocation15]] }
 0x176   : > { %3299 = sst [smem:[#allocation51_spill]] %s2513_s3  ;;  %s2528_s3 = sld [smem:[#allocation12 + $0x8]] }
 0x177   : > { %3300 = sst [smem:[#allocation52_spill]] %s2515_s27  ;;  %s2530_s27 = sld [smem:[#allocation12 + $0x14]]  ;;  %v772_v9 = vstv %s3329_s18 }
 0x178   : > { %s3330_s10 = sld [smem:[#allocation51_spill]]  ;;  %s3331_s25 = sld [smem:[#allocation52_spill]] }
 0x179   : > { %3332 = sst [smem:[#allocation76_spill]] %s2590_s20  ;;  %s3336_s19 = sld [smem:[#allocation55_spill]]  ;;  %v784_v8 = vstv %s3333_s26 }
 0x17a   : > { %3334 = sst [smem:[#allocation77_spill]] %s2592_s8  ;;  %s2602_s9 = sld [smem:[#allocation15 + $0xc]]  ;;  %v737_v62 = vstv %s3335_s4 }
 0x17b   : > { %s3338_s24 = sld [smem:[#allocation56_spill]]  ;;  %s2608_s20 = sld [smem:[#allocation15 + $0x18]] }
 0x17c   : > { %3306 = sst [smem:[#allocation58_spill]] %s2528_s3  ;;  %s3340_s8 = sld [smem:[#allocation57_spill]]  ;;  %v827_v15 = vstv %s2528_s3 }
 0x17d   : > { %3307 = sst [smem:[#allocation59_spill]] %s2530_s27  ;;  %s2610_s7 = sld [smem:[#allocation15 + $0x24]]  ;;  %v831_v60 = vstv %s2530_s27 }
 0x17e   : > { %v776_v38 = vstv %s3330_s10  ;;  %v780_v11 = vstv %s3331_s25  ;;  %s2616_s0 = sld [smem:[#allocation15 + $0x1]]  ;;  %s2618_s23 = sld [smem:[#allocation15 + $0xd]] }
 0x17f   : > { %v741_v7 = vstv %s3336_s19  ;;  %s2628_s18 = sld [smem:[#allocation15 + $0x19]]  ;;  %s2630_s25 = sld [smem:[#allocation15 + $0x25]] }
 0x180   : > { %3337 = sst [smem:[#allocation78_spill]] %s2602_s9  ;;  %s3342_s26 = sld [smem:[#allocation61_spill]] }
 0x181   : > { %3339 = sst [smem:[#allocation79_spill]] %s2608_s20  ;;  %v745_v43 = vstv %s3338_s24  ;;  %s3343_s10 = sld [smem:[#allocation62_spill]] }
 0x182   : > { %v749_v63 = vstv %s3340_s8  ;;  %s2642_s19 = sld [smem:[#allocation15 + $0x2]]  ;;  %s2644_s24 = sld [smem:[#allocation15 + $0xe]] }
 0x183   : > { %3341 = sst [smem:[#allocation80_spill]] %s2610_s7  ;;  %s3346_s8 = sld [smem:[#allocation65_spill]] }
 0x184   : > { %s2656_s4 = sld [smem:[#allocation15 + $0x1a]]  ;;  %s2658_s22 = sld [smem:[#allocation15 + $0x26]] }
 0x185   : > { %s2664_s13 = sld [smem:[#allocation15 + $0x3]]  ;;  %s2666_s16 = sld [smem:[#allocation15 + $0xf]] }
 0x186   : > { %v839_v28 = vstv %s3342_s26  ;;  %s2674_s30 = sld [smem:[#allocation15 + $0x27]]  ;;  %s3356_s26 = sld [smem:[#allocation70_spill]] }
 0x187   : > { %v792_v22 = vstv %s3343_s10  ;;  %s2692_s2 = sld [smem:[#allocation15 + $0x4]]  ;;  %s2694_s17 = sld [smem:[#allocation15 + $0x10]] }
 0x188   : > { %3344 = sst [smem:[#allocation81_spill]] %s2642_s19  ;;  %s3358_s11 = sld [smem:[#allocation71_spill]] }
 0x189   : > { %3345 = sst [smem:[#allocation82_spill]] %s2644_s24  ;;  %v804_v25 = vstv %s3346_s8  ;;  %s2703_s8 = sld [smem:[#allocation15 + $0x1c]] }
 0x18a   : > { %3347 = sst [smem:[#allocation83_spill]] %s2656_s4  ;;  %s2705_s10 = sld [smem:[#allocation15 + $0x28]] }
 0x18b   : > { %3348 = sst [smem:[#allocation84_spill]] %s2658_s22  ;;  %s2672_s22 = sld [smem:[#allocation15 + $0x1b]] }
 0x18c   : > { %3349 = sst [smem:[#allocation85_spill]] %s2664_s13  ;;  %s2713_s14 = sld [smem:[#allocation15 + $0x5]]  ;;  %v847_v14 = vstv %s3356_s26 }
 0x18d   : > { %3350 = sst [smem:[#allocation86_spill]] %s2666_s16  ;;  %s2729_s3 = sld [smem:[#allocation15 + $0x1d]]  ;;  %v999_v27 = vstv %s2692_s2 }
 0x18e   : > { %3354 = sst [smem:[#allocation87_spill]] %s2674_s30  ;;  %v851_v52 = vstv %s3358_s11  ;;  %s2741_s5 = sld [smem:[#allocation15 + $0x6]] }
 0x18f   : > { %3357 = sst [smem:[#allocation88_spill]] %s2694_s17  ;;  %s2715_s17 = sld [smem:[#allocation15 + $0x11]] }
 0x190   : > { %3360 = sst [smem:[#allocation89_spill]] %s2703_s8  ;;  %s2731_s8 = sld [smem:[#allocation15 + $0x29]] }
 0x191   : > { %3353 = sst [smem:[#allocation37_spill]] %s2672_s22  ;;  %s2743_s6 = sld [smem:[#allocation15 + $0x12]] }
 0x192   : > { %3362 = sst [smem:[#allocation90_spill]] %s2705_s10  ;;  %s2753_s30 = sld [smem:[#allocation15 + $0x1e]] }
 0x193   : > { %3364 = sst [smem:[#allocation38_spill]] %s2713_s14  ;;  %s2755_s27 = sld [smem:[#allocation15 + $0x2a]] }
 0x194   : > { %3368 = sst [smem:[#allocation91_spill]] %s2729_s3  ;;  %s3377_s1 = sld [smem:[#allocation88_spill]] }
 0x195   : > { %3371 = sst [smem:[#allocation93_spill]] %s2741_s5  ;;  %s3378_s26 = sld [smem:[#allocation89_spill]] }
 0x196   : > { %3370 = sst [smem:[#allocation92_spill]] %s2731_s8  ;;  %s2767_s11 = sld [smem:[#allocation15 + $0x13]] }
 0x197   : > { %3372 = sst [smem:[#allocation94_spill]] %s2743_s6  ;;  %s3379_s21 = sld [smem:[#allocation90_spill]] }
 0x198   : > { %3373 = sst [smem:[#allocation95_spill]] %s2753_s30  ;;  %s2793_s7 = sld [smem:[#allocation15 + $0x1f]] }
 0x199   : > { %3374 = sst [smem:[#allocation96_spill]] %s2755_s27  ;;  %s2795_s9 = sld [smem:[#allocation15 + $0x2b]] }
 0x19a   : > { %s2837_s19 = sld [smem:[#allocation15 + $0xa]]  ;;  %s2839_s22 = sld [smem:[#allocation15 + $0x16]] }
 0x19b   : > { %v1007_v45 = vstv %s3378_s26  ;;  %s2857_s30 = sld [smem:[#allocation15 + $0x8]]  ;;  %s2859_s10 = sld [smem:[#allocation15 + $0x14]] }
 0x19c   : > { %s2869_s24 = sld [smem:[#allocation15 + $0x20]]  ;;  %s2871_s4 = sld [smem:[#allocation15 + $0x2c]] }
 0x19d   : > { %s2876_s27 = sld [smem:[#allocation15 + $0x9]]  ;;  %s2878_s13 = sld [smem:[#allocation15 + $0x15]] }
 0x19e   : > { %3389 = sst [smem:[#allocation88_spill]] %s2793_s7  ;;  %s3415_s14 = sld [smem:[#allocation73_spill]] }
 0x19f   : > { %3391 = sst [smem:[#allocation89_spill]] %s2795_s9  ;;  %s2899_s20 = sld [smem:[#allocation15 + $0x2e]] }
 0x1a0   : > { %3400 = sst [smem:[#allocation90_spill]] %s2837_s19  ;;  %s2901_s3 = sld [smem:[#allocation15 + $0xb]] }
 0x1a1   : > { %3402 = sst [smem:[#allocation39_spill]] %s2839_s22  ;;  %s3419_s16 = sld [smem:[#allocation66_spill]] }
 0x1a2   : > { %s3420_s6 = sld [smem:[#allocation67_spill]]  ;;  %s2911_s5 = sld [smem:[#allocation15 + $0x17]] }
 0x1a3   : > { %s2913_s8 = sld [smem:[#allocation15 + $0x23]]  ;;  %s3423_s28 = sld [smem:[#allocation68_spill]] }
 0x1a4   : > { %s3432_s29 = sld [smem:[#allocation79_spill]]  ;;  %s3449_s2 = sld [smem:[#allocation37_spill]] }
 0x1a5   : > { %s3455_s26 = sld [smem:[#allocation87_spill]] }
 0x1a6   : > { %3416 = sst [smem:[#allocation43_spill]] %s2901_s3 }
 0x1a8   : > { %3421 = sst [smem:[#allocation44_spill]] %s2911_s5 }
 0x1a9   : > { %3422 = sst [smem:[#allocation45_spill]] %s2913_s8 }
 0x1d6   : > { %v710_v41 = vpop.permute.xlu1 %709  ;;  %v671_v29 = vpop.permute.xlu0 %670 }
 0x1d7   : > { %v715_v17 = vmul.f32 %v2545_v46, %v710_v41  ;;  %v676_v39 = vmul.f32 %v2597_v20, %v671_v29 }
 0x1d9   : > { %v679_v29 = vmul.f32 %v678_v21, %v676_v39  ;;  %v683_v53 = vmul.f32 %v682_v37, %v676_v39  ;;  %v687_v49 = vmul.f32 %v686_v1, %v676_v39  ;;  %v691_v44 = vmul.f32 %v690_v4, %v676_v39 }
 0x1da   : > { %v769_v35 = vpop.permute.xlu1 %768  ;;  %v734_v0 = vpop.permute.xlu0 %733  ;;  %v718_v41 = vmul.f32 %v717_v47, %v715_v17  ;;  %v722_v39 = vmul.f32 %v721_v12, %v715_v17  ;;  %v726_v47 = vmul.f32 %v725_v50, %v715_v17 }
 0x1db   : > { %v735_v31 = vmul.f32 %v734_v0, %v2597_v20  ;;  %v680_v21 = vadd.f32 %v679_v29, %v662_v56  ;;  %v684_v37 = vadd.f32 %v683_v53, %v664_v61  ;;  %v688_v1 = vadd.f32 %v687_v49, %v666_v57 }
 0x1dc   : > { %v692_v4 = vadd.f32 %v691_v44, %v668_v18  ;;  %v730_v0 = vmul.f32 %v729_v13, %v715_v17  ;;  %v770_v42 = vmul.f32 %v769_v35, %v2545_v46  ;;  %v1060_v44 = vstv %s2793_s7  ;;  %s2882_s7 = sld [smem:[#allocation15 + $0x21]] }
 0x1dd   : > { %v696_v24 = vadd.f32 %v2621_v6, %v680_v21  ;;  %v700_v56 = vadd.f32 %v2624_v2, %v684_v37  ;;  %v704_v29 = vadd.f32 %v2633_v23, %v688_v1  ;;  %v738_v12 = vmul.f32 %v737_v62, %v735_v31 }
 0x1de   : > { %v708_v61 = vadd.f32 %v2636_v55, %v692_v4  ;;  %v789_v57 = vpop.permute.xlu0 %788  ;;  %v742_v50 = vmul.f32 %v741_v7, %v735_v31  ;;  %v746_v13 = vmul.f32 %v745_v43, %v735_v31  ;;  %v750_v18 = vmul.f32 %v749_v63, %v735_v31  ;;  %v824_v49 = vpop.permute.xlu1 %823 }
 0x1df   : > { %v719_v6 = vadd.f32 %v718_v41, %v696_v24  ;;  %v723_v2 = vadd.f32 %v722_v39, %v700_v56  ;;  %v727_v23 = vadd.f32 %v726_v47, %v704_v29  ;;  %v773_v62 = vmul.f32 %v772_v9, %v770_v42 }
 0x1e0   : > { %v731_v55 = vadd.f32 %v730_v0, %v708_v61  ;;  %v790_v7 = vmul.f32 %v789_v57, %v2597_v20  ;;  %v1064_v43 = vstv %s2795_s9  ;;  %v777_v17 = vmul.f32 %v776_v38, %v770_v42  ;;  %s3414_s9 = sld [smem:[#allocation72_spill]] }
 0x1e1   : > { %v739_v63 = vadd.f32 %v738_v12, %v719_v6  ;;  %v743_v31 = vadd.f32 %v742_v50, %v723_v2  ;;  %v747_v53 = vadd.f32 %v746_v13, %v727_v23  ;;  %v781_v24 = vmul.f32 %v780_v11, %v770_v42 }
 0x1e2   : > { %v751_v35 = vadd.f32 %v750_v18, %v731_v55  ;;  %v785_v41 = vmul.f32 %v784_v8, %v770_v42  ;;  %v825_v9 = vmul.f32 %v824_v49, %v2545_v46  ;;  %v844_v39 = vpop.permute.xlu0 %843  ;;  %v793_v38 = vmul.f32 %v792_v22, %v790_v7  ;;  %v879_v47 = vpop.permute.xlu1 %878 }
 0x1e3   : > { %v755_v21 = vadd.f32 %v2640_v58, %v739_v63  ;;  %v759_v37 = vadd.f32 %v2647_v26, %v743_v31  ;;  %v763_v1 = vadd.f32 %v2650_v59, %v747_v53  ;;  %v797_v11 = vmul.f32 %v796_v34, %v790_v7 }
 0x1e4   : > { %v767_v4 = vadd.f32 %v2653_v10, %v751_v35  ;;  %v801_v8 = vmul.f32 %v800_v3, %v790_v7  ;;  %v805_v58 = vmul.f32 %v804_v25, %v790_v7  ;;  %v828_v22 = vmul.f32 %v827_v15, %v825_v9 }
 0x1e5   : > { %v774_v26 = vadd.f32 %v773_v62, %v755_v21  ;;  %v778_v59 = vadd.f32 %v777_v17, %v759_v37  ;;  %v782_v10 = vadd.f32 %v781_v24, %v763_v1  ;;  %v845_v34 = vmul.f32 %v844_v39, %v2597_v20 }
 0x1e6   : > { %v786_v42 = vadd.f32 %v785_v41, %v767_v4  ;;  %v1105_v3 = vstv %s2837_s19  ;;  %v1109_v25 = vstv %s2839_s22  ;;  %v832_v15 = vmul.f32 %v831_v60, %v825_v9  ;;  %s2891_s19 = sld [smem:[#allocation15 + $0x2d]]  ;;  %s2893_s22 = sld [smem:[#allocation15 + $0x22]] }
 0x1e7   : > { %v794_v0 = vadd.f32 %v793_v38, %v774_v26  ;;  %v798_v56 = vadd.f32 %v797_v11, %v778_v59  ;;  %v802_v29 = vadd.f32 %v801_v8, %v782_v10  ;;  %v836_v20 = vmul.f32 %v835_v19, %v825_v9 }
 0x1e8   : > { %v806_v61 = vadd.f32 %v805_v58, %v786_v42  ;;  %v840_v57 = vmul.f32 %v839_v28, %v825_v9  ;;  %v880_v12 = vmul.f32 %v879_v47, %v2545_v46  ;;  %v848_v46 = vmul.f32 %v847_v14, %v845_v34 }
 0x1e9   : > { %v810_v50 = vadd.f32 %v2680_v5, %v794_v0  ;;  %v814_v13 = vadd.f32 %v2685_v32, %v798_v56  ;;  %v818_v18 = vadd.f32 %v2690_v33, %v802_v29  ;;  %v852_v19 = vmul.f32 %v851_v52, %v845_v34 }
 0x1ea   : > { %v822_v60 = vadd.f32 %v2699_v48, %v806_v61  ;;  %v3417_v28 = vstv %s3414_s9  ;;  %v3418_v6 = vstv %s3415_s14  ;;  %v1070_v55 = vstv %s2857_s30  ;;  %s3424_s9 = sld [smem:[#allocation69_spill]]  ;;  %s3434_s14 = sld [smem:[#allocation80_spill]] }
 0x1eb   : > { %v856_v5 = vmul.f32 %v3417_v28, %v845_v34  ;;  %v860_v32 = vmul.f32 %v3418_v6, %v845_v34  ;;  %v829_v33 = vadd.f32 %v828_v22, %v810_v50  ;;  %v833_v48 = vadd.f32 %v832_v15, %v814_v13 }
 0x1ec   : > { %v837_v2 = vadd.f32 %v836_v20, %v818_v18  ;;  %v841_v23 = vadd.f32 %v840_v57, %v822_v60  ;;  %v1074_v14 = vstv %s2859_s10  ;;  %v1078_v52 = vstv %s2869_s24  ;;  %s3489_s24 = sld [smem:[#allocation30_spill]] }
 0x1ed   : > { %v1082_v49 = vstv %s2871_s4  ;;  %v849_v62 = vadd.f32 %v848_v46, %v829_v33  ;;  %v853_v7 = vadd.f32 %v852_v19, %v833_v48  ;;  %v3425_v53 = vstv %s3419_s16  ;;  %s3436_s16 = sld [smem:[#allocation81_spill]]  ;;  %s3491_s4 = sld [smem:[#allocation35_spill]] }
 0x1ee   : > { %v857_v63 = vadd.f32 %v856_v5, %v837_v2  ;;  %v861_v31 = vadd.f32 %v860_v32, %v841_v23  ;;  %v883_v35 = vmul.f32 %v3425_v53, %v880_v12  ;;  %v3426_v17 = vstv %s3420_s6  ;;  %s3430_s6 = sld [smem:[#allocation78_spill]] }
 0x1ef   : > { %v887_v24 = vmul.f32 %v3426_v17, %v880_v12  ;;  %v1089_v41 = vstv %s2876_s27  ;;  %v1093_v9 = vstv %s2878_s13  ;;  %v865_v21 = vadd.f32 %v2711_v30, %v849_v62 }
 0x1f0   : > { %v869_v37 = vadd.f32 %v2722_v16, %v853_v7  ;;  %v873_v1 = vadd.f32 %v2727_v51, %v857_v63  ;;  %v877_v4 = vadd.f32 %v2739_v54, %v861_v31  ;;  %v3427_v39 = vstv %s3423_s28  ;;  %s3437_s28 = sld [smem:[#allocation82_spill]] }
 0x1f1   : > { %v891_v38 = vmul.f32 %v3427_v39, %v880_v12  ;;  %v1097_v11 = vstv %s2882_s7  ;;  %v1101_v8 = vstv %s2891_s19  ;;  %v1113_v58 = vstv %s2893_s22  ;;  %s3493_s22 = sld [smem:[#allocation33_spill]] }
 0x1f2   : > { %v3428_v26 = vstv %s3424_s9  ;;  %v884_v10 = vadd.f32 %v883_v35, %v865_v21  ;;  %v888_v30 = vadd.f32 %v887_v24, %v869_v37  ;;  %v1117_v16 = vstv %s2899_s20  ;;  %s3438_s9 = sld [smem:[#allocation83_spill]]  ;;  %s1492_s7 = sshll.u32 %s3489_s24, 9 }
 0x1f3   : > { %v895_v59 = vmul.f32 %v3428_v26, %v880_v12  ;;  %v2937_v51 = vadd.f32 %v891_v38, %v873_v1  ;;  %v1123_v42 = vstv %s2901_s3  ;;  %v1127_v54 = vstv %s2911_s5  ;;  %s3446_s5 = sld [smem:[#allocation85_spill]]  ;;  %s3447_s3 = sld [smem:[#allocation86_spill]] }
 0x1f4   : > { %v1131_v47 = vstv %s2913_s8  ;;  %v927_v34 = vrot.slane %v884_v10, 7  ;;  %v3429_v0 = vstv %s2616_s0  ;;  %v3431_v29 = vstv %s2618_s23  ;;  %s3439_s8 = sld [smem:[#allocation74_spill]]  ;;  %s3441_s0 = sld [smem:[#allocation75_spill]] }
 0x1f5   : > { %v2942_v22 = vadd.f32 %v895_v59, %v877_v4  ;;  %v947_v56 = vmul.f32 %v3429_v0, %v884_v10  ;;  %v951_v61 = vmul.f32 %v3431_v29, %v884_v10  ;;  %v3433_v15 = vstv %s2628_s18  ;;  %s3442_s23 = sld [smem:[#allocation76_spill]]  ;;  %s3443_s18 = sld [smem:[#allocation77_spill]] }
 0x1f6   : > { %v955_v20 = vmul.f32 %v3433_v15, %v884_v10  ;;  %v3435_v57 = vstv %s2630_s25  ;;  %v961_v50 = vrot.slane %v884_v10, 1  ;;  %v980_v13 = vrot.slane %v888_v30, 7  ;;  %s3444_s25 = sld [smem:[#allocation84_spill]]  ;;  %s3492_s19 = sshll.u32 %s3491_s4, 5 }
 0x1f7   : > { %v959_v12 = vmul.f32 %v3435_v57, %v884_v10  ;;  %v928_v18 = vmul.f32 %v2746_v36, %v927_v34  ;;  %v1000_v60 = vmul.f32 %v999_v27, %v888_v30  ;;  %v3440_v46 = vstv %s3377_s1  ;;  %s3463_s1 = sld [smem:[#allocation38_spill]]  ;;  %s413_s27 = scalar_lea.vmem [#allocation18], %s3492_s19 }
 0x1f8   : > { %v1004_v19 = vmul.f32 %v3440_v46, %v888_v30  ;;  %v1008_v28 = vmul.f32 %v1007_v45, %v888_v30  ;;  %v962_v5 = vmul.f32 %v2749_v40, %v961_v50  ;;  %v981_v6 = vmul.f32 %v2746_v36, %v980_v13  ;;  %s1156_s13 = sshll.u32 %s413_s27, 4  ;;  %p3495_p7 = scmp.ne.s32.totalorder %s3493_s22, 0  ;;  %s3077_s13 = int_to_ptr.vmem [resolvable:$true] %s1156_s13 }
 0x1f9   : > { %v3445_v32 = vstv %s3379_s21  ;;  %v1014_v48 = vrot.slane %v888_v30, 1  ;;  %v3448_v2 = vstv %s2600_s15  ;;  %v3450_v23 = vstv %s3430_s6  ;;  %s3466_s15 = sld [smem:[#allocation91_spill]]  ;;  %s3470_s21 = sld [smem:[#allocation93_spill]] }
 0x1fa   : > { %v1012_v33 = vmul.f32 %v3445_v32, %v888_v30  ;;  %v931_v27 = vmul.f32 %v3448_v2, %v928_v18  ;;  %v935_v62 = vmul.f32 %v3450_v23, %v928_v18  ;;  %v3451_v7 = vstv %s3432_s29  ;;  %s3476_s6 = sld [smem:[#allocation96_spill]] }
 0x1fb   : > { %v939_v63 = vmul.f32 %v3451_v7, %v928_v18  ;;  %v3452_v31 = vstv %s3434_s14  ;;  %v3453_v53 = vstv %s3436_s16  ;;  %v3454_v17 = vstv %s3437_s28 }
 0x1fc   : > { %v943_v45 = vmul.f32 %v3452_v31, %v928_v18  ;;  %v965_v35 = vmul.f32 %v3453_v53, %v962_v5  ;;  %v969_v24 = vmul.f32 %v3454_v17, %v962_v5  ;;  %v3456_v21 = vstv %s3438_s9  ;;  %s3494_s9 = sld [smem:[#allocation105_spill]] }
 0x1fd   : > { %v973_v37 = vmul.f32 %v3456_v21, %v962_v5  ;;  %v1033_v1 = vrot.slane %v2937_v51, 7  ;;  %v3457_v4 = vstv %s3439_s8  ;;  %v3458_v38 = vstv %s3441_s0  ;;  %s3468_s8 = sld [smem:[#allocation92_spill]] }
 0x1fe   : > { %v932_v39 = vadd.f32 %v931_v27, %v3457_v4  ;;  %v936_v26 = vadd.f32 %v935_v62, %v3458_v38  ;;  %v3459_v59 = vstv %s3442_s23  ;;  %v3460_v30 = vstv %s3443_s18  ;;  %s1143_s23 = scalar_lea.sflag [#allocation5], %s3491_s4  ;;  %s1766_s18 = scalar_lea.vmem %s3077_s13, 512 }
 0x1ff   : > { %v940_v10 = vadd.f32 %v939_v63, %v3459_v59  ;;  %v944_v34 = vadd.f32 %v943_v45, %v3460_v30  ;;  %v3461_v0 = vstv %s3444_s25  ;;  %v3462_v15 = vstv %s3446_s5  ;;  %s3471_s5 = sld [smem:[#allocation94_spill]]  ;;  %p1767_p5 = scmp.ne.s32.totalorder %s3077_s13, %s1766_s18 }
 0x200   : > { %v977_v29 = vmul.f32 %v3461_v0, %v962_v5  ;;  %v984_v57 = vmul.f32 %v3462_v15, %v981_v6  ;;  %v3464_v50 = vstv %s3447_s3  ;;  %v3465_v18 = vstv %s3449_s2  ;;  %s3472_s3 = sld [smem:[#allocation95_spill]]  ;;  %s1869_s25 = smov [#allocation18]  }
 0x201   : > { %v988_v13 = vmul.f32 %v3464_v50, %v981_v6  ;;  %v992_v46 = vmul.f32 %v3465_v18, %v981_v6  ;;  %v948_v32 = vadd.f32 %v947_v56, %v932_v39  ;;  %v952_v2 = vadd.f32 %v951_v61, %v936_v26  ;;  %p1768_p9 = pnand %p1767_p5, %p3495_p7  ;;  %s1770_s2 = sshll.u32 %s1869_s25, 4  ;;  %s1771_s2 = int_to_ptr.vmem [resolvable:$false] %s1770_s2 }
 0x202   : > { %v956_v27 = vadd.f32 %v955_v20, %v940_v10  ;;  %v960_v23 = vadd.f32 %v959_v12, %v944_v34  ;;  %v3467_v62 = vstv %s3455_s26  ;;  %v1015_v63 = vmul.f32 %v2749_v40, %v1014_v48  ;;  %s3075_s0 = scalar_lea.hbm %s3494_s9, %s1492_s7  ;;  %s1772_s26 = scalar_lea.vmem %s1771_s2, 1024 }
 0x203   : > { %v996_v7 = vmul.f32 %v3467_v62, %v981_v6  ;;  %v1034_v5 = vmul.f32 %v2746_v36, %v1033_v1  ;;  %v3469_v31 = vstv %s2765_s12  ;;  %v966_v53 = vadd.f32 %v965_v35, %v948_v32  ;;  %s3010_s12 = sld [smem:[#allocation15 + $0x2f]]  ;;  %p1769_p8 = pneg %p1768_p9 }
 0x204   : > { %v1053_v45 = vmul.f32 %v3469_v31, %v2937_v51  ;;  %v970_v17 = vadd.f32 %v969_v24, %v952_v2  ;;  %v974_v21 = vadd.f32 %v973_v37, %v956_v27  ;;  %v978_v56 = vadd.f32 %v977_v29, %v960_v23  ;;  %p1773_p6 = scmp.lt.s32.totalorder %s3077_s13, %s1771_s2  ;;  %p1774_p1 = scmp.lt.s32.totalorder %s1772_s26, %s1766_s18 }
 0x205   : > { %v3473_v61 = vstv %s3463_s1  ;;  %v3474_v12 = vstv %s2715_s17  ;;  %v3475_v6 = vstv %s3466_s15  ;;  %v3477_v39 = vstv %s2767_s11 }
 0x206   : > { %v1018_v20 = vmul.f32 %v3473_v61, %v1015_v63  ;;  %v1022_v4 = vmul.f32 %v3474_v12, %v1015_v63  ;;  %v1026_v48 = vmul.f32 %v3475_v6, %v1015_v63  ;;  %v1057_v1 = vmul.f32 %v3477_v39, %v2937_v51  ;;  %p1775_p3 = por %p1774_p1, %p1773_p6 }
 0x207   : > { %v985_v38 = vadd.f32 %v984_v57, %v966_v53  ;;  %v989_v26 = vadd.f32 %v988_v13, %v970_v17  ;;  %v993_v35 = vadd.f32 %v992_v46, %v974_v21  ;;  %v997_v59 = vadd.f32 %v996_v7, %v978_v56 }
 0x208   : > { %v3479_v24 = vstv %s3468_s8  ;;  %v3480_v10 = vstv %s3470_s21  ;;  %v3482_v34 = vstv %s3471_s5  ;;  %v3483_v29 = vstv %s3472_s3  ;;  %p1776_p2 = pnand %p1775_p3, %p1769_p8 }
 0x209   : > { %v1030_v37 = vmul.f32 %v3479_v24, %v1015_v63  ;;  %v1037_v30 = vmul.f32 %v3480_v10, %v1034_v5  ;;  %v1041_v0 = vmul.f32 %v3482_v34, %v1034_v5  ;;  %v1045_v15 = vmul.f32 %v3483_v29, %v1034_v5 }
 0x20a   : > { %v1001_v50 = vadd.f32 %v1000_v60, %v985_v38  ;;  %v1005_v18 = vadd.f32 %v1004_v19, %v989_v26  ;;  %v1009_v32 = vadd.f32 %v1008_v28, %v993_v35  ;;  %v1013_v2 = vadd.f32 %v1012_v33, %v997_v59 }
 0x20b   : > { %v3484_v27 = vstv %s3476_s6  ;;  %v1061_v57 = vmul.f32 %v1060_v44, %v2937_v51  ;;  %v1067_v13 = vrot.slane %v2937_v51, 1  ;;  %v1086_v46 = vrot.slane %v2942_v22, 7 }
 0x20c   : > { %v1049_v23 = vmul.f32 %v3484_v27, %v1034_v5  ;;  %v1019_v62 = vadd.f32 %v1018_v20, %v1001_v50  ;;  %v1023_v7 = vadd.f32 %v1022_v4, %v1005_v18  ;;  %v1027_v63 = vadd.f32 %v1026_v48, %v1009_v32 }
 0x20d   : > { %v1031_v60 = vadd.f32 %v1030_v37, %v1013_v2  ;;  %v1065_v19 = vmul.f32 %v1064_v43, %v2937_v51  ;;  %v1068_v28 = vmul.f32 %v2749_v40, %v1067_v13  ;;  %v1087_v33 = vmul.f32 %v2746_v36, %v1086_v46 }
 0x20e   : > { %v1120_v44 = vrot.slane %v2942_v22, 1  ;;  %v1038_v5 = vadd.f32 %v1037_v30, %v1019_v62  ;;  %v1042_v31 = vadd.f32 %v1041_v0, %v1023_v7  ;;  %v1046_v53 = vadd.f32 %v1045_v15, %v1027_v63 }
 0x20f   : > { %v1050_v17 = vadd.f32 %v1049_v23, %v1031_v60  ;;  %v1071_v21 = vmul.f32 %v1070_v55, %v1068_v28  ;;  %v1075_v56 = vmul.f32 %v1074_v14, %v1068_v28  ;;  %v1079_v43 = vmul.f32 %v1078_v52, %v1068_v28 }
 0x210   : > { %v1135_v51 = vstv %s3010_s12  ;;  %v1054_v36 = vadd.f32 %v1053_v45, %v1038_v5  ;;  %v1058_v61 = vadd.f32 %v1057_v1, %v1042_v31  ;;  %v1062_v20 = vadd.f32 %v1061_v57, %v1046_v53 }
 0x211   : > { %v1066_v12 = vadd.f32 %v1065_v19, %v1050_v17  ;;  %v1121_v4 = vmul.f32 %v2749_v40, %v1120_v44  ;;  %v1083_v6 = vmul.f32 %v1082_v49, %v1068_v28  ;;  %v1090_v55 = vmul.f32 %v1089_v41, %v1087_v33 }
 0x212   : > { %v1094_v14 = vmul.f32 %v1093_v9, %v1087_v33  ;;  %v1072_v52 = vadd.f32 %v1071_v21, %v1054_v36  ;;  %v1076_v48 = vadd.f32 %v1075_v56, %v1058_v61  ;;  %v1080_v39 = vadd.f32 %v1079_v43, %v1062_v20 }
 0x213   : > { %v1098_v45 = vmul.f32 %v1097_v11, %v1087_v33  ;;  %v1084_v1 = vadd.f32 %v1083_v6, %v1066_v12  ;;  %v1102_v38 = vmul.f32 %v1101_v8, %v1087_v33  ;;  %v1106_v40 = vmul.f32 %v1105_v3, %v2942_v22 }
 0x214   : > { %v1110_v49 = vmul.f32 %v1109_v25, %v2942_v22  ;;  %v1091_v41 = vadd.f32 %v1090_v55, %v1072_v52  ;;  %v1095_v9 = vadd.f32 %v1094_v14, %v1076_v48  ;;  %v1114_v35 = vmul.f32 %v1113_v58, %v2942_v22 }
 0x215   : > { %v1099_v26 = vadd.f32 %v1098_v45, %v1080_v39  ;;  %v1103_v59 = vadd.f32 %v1102_v38, %v1084_v1  ;;  %v1118_v11 = vmul.f32 %v1117_v16, %v2942_v22  ;;  %v1124_v24 = vmul.f32 %v1123_v42, %v1121_v4 }
 0x216   : > { %v1128_v8 = vmul.f32 %v1127_v54, %v1121_v4  ;;  %v1107_v37 = vadd.f32 %v1106_v40, %v1091_v41  ;;  %v1111_v3 = vadd.f32 %v1110_v49, %v1095_v9  ;;  %v1132_v25 = vmul.f32 %v1131_v47, %v1121_v4 }
 0x217   : > { %v1115_v10 = vadd.f32 %v1114_v35, %v1099_v26  ;;  %v1119_v58 = vadd.f32 %v1118_v11, %v1103_v59  ;;  %v1136_v30 = vmul.f32 %v1135_v51, %v1121_v4 }
 0x218   : > { %v1125_v34 = vadd.f32 %v1124_v24, %v1107_v37  ;;  %v1129_v0 = vadd.f32 %v1128_v8, %v1111_v3 }
 0x219   : > { %v1133_v16 = vadd.f32 %v1132_v25, %v1115_v10  ;;  %v1137_v42 = vadd.f32 %v1136_v30, %v1119_v58 }
 0x21a   : > { %1138 = vst [vmem:[%s413_s27] sm:$0xff] %v1125_v34  ;;  %1483 = vst [vmem:[%s413_s27 + $0x8] sm:$0xff] %v1129_v0 }
 0x21b   : > { %1484 = vst [vmem:[%s413_s27 + $0x10] sm:$0xff] %v1133_v16  ;;  %1485 = vst [vmem:[%s413_s27 + $0x18] sm:$0xff] %v1137_v42 }
 0x21c   : > { %1779 = shalt.err (!%p1776_p2)
}
 0x21d   : > { %s1780_s1 = scalar_lea.hbm %s3075_s0, 512  ;;  %s1784_s21 = scalar_lea.hbm %s3494_s9, 1024 }
 0x21e   : > { %p1781_p11 = scmp.ne.s32.totalorder %s3075_s0, %s1780_s1  ;;  %p1785_p13 = scmp.lt.u32.totalorder %s3075_s0, %s3494_s9 }
 0x21f   : > { %p1786_p4 = scmp.lt.u32.totalorder %s1784_s21, %s1780_s1  ;;  %p1788_p5 = scmp.lt.u32.totalorder %s1780_s1, %s3075_s0 }
 0x220   : > { %p1782_p12 = pnand %p1781_p11, %p3495_p7 }
 0x221   : > { %p1787_p0 = por %p1786_p4, %p1785_p13 }
 0x222   : > { %p1783_p10 = pneg %p1782_p12 }
 0x223   : > { %p1789_p9 = por %p1788_p5, %p1787_p0 }
 0x225   : > { %p1790_p8 = pnand %p1789_p9, %p1783_p10 }
 0x227   : > { %1793 = shalt.err (!%p1790_p8)
}
 0x228   : > { %s1870_s6 = smov 128   ;;  %s3496_s29 = smov 8  }
 0x229   : > { %1523 = dma.vmem_to_hbm [thread:$0]  (%p3495_p7), %s3077_s13, 512, %s3075_s0, %s1143_s23, %s1870_s6, %s1870_s6, %s3496_s29  }
 0x22a PF: > { %s3497_s12 = sld [smem:[#allocation26_spill]]  ;;  %s3498_s14 = sld [smem:[#allocation34_spill]] }
 0x22b   : > { %s3499_s17 = sld [smem:[#allocation29_spill]] }
 0x230   : > { %s1171_s11 = sand.u32 1, %s3497_s12   ;;  %p3500_p6 = scmp.ne.s32.totalorder %s3498_s14, 0 }
 0x231   : > { %p3501_p1 = scmp.ge.s32.totalorder %s3499_s17, 2  ;;  %s1172_s30 = scalar_lea.sflag [#allocation5], %s1171_s11 }
 0x233   : > { %p1552_p3 = pnand %p3501_p1, %p3500_p6 }
 0x235   : > { %1835 = dma.done.wait (!%p1552_p3), %s1172_s30, 512  }
 0x236   : > { %1837 = vsyncadd (!%p1552_p3), %s1172_s30, 4294966784  ;;  %s3502_s30 = sld [smem:[#allocation31_spill]]  ;;  %s3503_s27 = sld [smem:[#allocation27_spill]] }
 0x237   : > { %s3504_s28 = sld [smem:[#allocation28_spill]]  ;;  %s3505_s29 = sld [smem:[#allocation32_spill]] }
 0x23c   : > { %p26_p2 = scmp.ge.s32.totalorder %s3502_s30, 4  }
 0x23e   :  { %28 = sbr.rel (!%p26_p2) target bundleno = 20 (0x14), region = 135 }
 0x245   :  { %1177 = vsyncpa [#allocation4], 1 }
 0x246   :  { %1179 = vsyncpa [#allocation4 + $0x1], 1 }
 0x247   :  { %1180 = vsyncpa [#allocation8], 1 }
 0x248   :  { %1181 = vsyncpa [#allocation5], 1 }
 0x249   :  { %1183 = vsyncpa [#allocation5 + $0x1], 1 }
 0x24a   :  { %1184 = vsyncpa [#allocation6], 1 }
 0x24b   :  { %1186 = vsyncpa [#allocation6 + $0x1], 1 }
 0x24c   :  { %1187 = vsyncpa [#allocation11], 1 }
 0x24d   :  { %1188 = vsyncpa [#allocation14], 1 }
 0x24e   :  { %1189 = vsyncpa [#allocation17], 1 }

</bundles_post_ra>
